<compile_context>
chip_gen: v7x
topology: tpu7x:2x2x1
jax: 0.10.0
libtpu: 0.0.40
codegen_flags: <defaults>
</compile_context>

<pallas_src>
import functools

import numpy as np
import jax
import jax.numpy as jnp
from jax import lax
from jax.experimental import pallas as pl
from jax.experimental.pallas import tpu as pltpu


def _round_up(x, m):
    return ((x + m - 1) // m) * m


def _mpc_kernel(x_ref, w_ref, b_ref, out_ref, pad_ref, *, ksize, lpad):
    # x_ref: (H, Wp, 2*Cp) bf16 -- adjacent W columns folded onto the lane dim.
    H, Wp, C2 = x_ref.shape
    Cp = C2 // 2
    Hp = H // 2
    P = ksize // 2
    Hpad, Wpad, _ = pad_ref.shape

    # ---- 2x2 mean pool: pure VPU --------------------------------------------
    # W-pairing = two 128-aligned lane slices; H-pairing = outer-dim reshape.
    # All adds in f32 (v5e has no bf16 VALU); single downcast at the store.
    left = x_ref[:, :, 0:Cp].astype(jnp.float32)
    right = x_ref[:, :, Cp:2 * Cp].astype(jnp.float32)
    cols = left + right                                  # (H, Wp, Cp) f32
    c = cols.reshape(Hp, 2, Wp, Cp)
    pooled = (c[:, 0] + c[:, 1]) * 0.25                  # (Hp, Wp, Cp) f32

    # ---- halo handling -------------------------------------------------------
    # Scratch persists across grid steps / cores; the interior is fully
    # rewritten every step, so re-zeroing only the thin halo keeps it correct
    # even when the batch grid axis is sharded across v7x's two TensorCores.
    # The interior lives at sublane offset `lpad` (multiple of 8) so the big
    # pooled store is an unmasked vst.
    if P > 0:
        pad_ref[0:P, :, :] = jnp.zeros((P, Wpad, Cp), pad_ref.dtype)
        pad_ref[Hp + P:Hpad, :, :] = jnp.zeros((Hpad - Hp - P, Wpad, Cp), pad_ref.dtype)
        pad_ref[P:Hp + P, 0:lpad, :] = jnp.zeros((Hp, lpad, Cp), pad_ref.dtype)
        pad_ref[P:Hp + P, lpad + Wp:Wpad, :] = jnp.zeros((Hp, Wpad - lpad - Wp, Cp),
                                                         pad_ref.dtype)
    pad_ref[P:Hp + P, lpad:lpad + Wp, :] = pooled.astype(pad_ref.dtype)

    # ---- KxK same-conv: tap-wise MXU accumulation (no im2col patches buffer)
    # Each tap is a slice of the pad scratch fed straight to the MXU with a
    # single shared f32 accumulator.  Contraction depth is Cp (=128 typical):
    # native on v5e's 4x128^2 MXU; on v6e/v7x half-depth, but this kernel is
    # traffic-bound, not MXU-depth-bound, so per-tap wins overall.
    base = lpad - P
    acc = jnp.zeros((Hp * Wp, Cp), jnp.float32)
    for dy in range(ksize):                              # static unroll: K*K dots
        for dx in range(ksize):
            tap = pad_ref[dy:dy + Hp, base + dx:base + dx + Wp, :]
            acc = acc + jnp.dot(tap.reshape(Hp * Wp, Cp), w_ref[dy, dx],
                                preferred_element_type=jnp.float32)
    acc = acc + b_ref[...]                               # (1, Cp) broadcast
    out_ref[...] = acc.reshape(Hp, Wp, Cp).astype(out_ref.dtype)


def prepare_mean_pool_conv_params(weight_oihw, bias=None):
    """One-time parameter prep (hoist out of the forward pass).

    OIHW conv weight -> (K, K, Cp, Cp) bf16 per-tap matrices, bias -> (1, Cp)
    f32, channels zero-padded to a multiple of 128 lanes."""
    O, I, K, K2 = weight_oihw.shape
    assert K == K2 and K % 2 == 1, "square odd kernel"
    assert O == I, "MeanPoolConv has in_channels == out_channels"
    Cp = _round_up(O, 128)
    w = jnp.transpose(weight_oihw, (2, 3, 1, 0)).astype(jnp.float32)   # (K,K,Cin,Cout)
    w = jnp.pad(w, ((0, 0), (0, 0), (0, Cp - I), (0, Cp - O)))
    w = w.astype(jnp.bfloat16)                                         # (K,K,Cp,Cp)
    b = bias if bias is not None else jnp.zeros((O,), jnp.float32)
    b = jnp.pad(b.astype(jnp.float32), (0, Cp - O)).reshape(1, Cp)
    return w, b


def mean_pool_conv_nhwc(x_nhwc, w_taps, b_row, *, out_dtype=jnp.float32):
    """Fused 2x2 mean-pool + KxK same-conv.  x: (B, H, W, Cp) with Cp a
    multiple of 128 (any float dtype; cast to bf16 internally).
    Returns (B, H/2, W/2, Cp) in out_dtype."""
    B, H, W, Cp = x_nhwc.shape
    K = w_taps.shape[0]
    P = K // 2
    assert H % 2 == 0 and W % 2 == 0, "2x2 mean pool needs even spatial dims"
    assert Cp % 128 == 0, "channels must be lane-padded to a multiple of 128"
    assert w_taps.shape == (K, K, Cp, Cp) and b_row.shape == (1, Cp)
    Hp, Wp = H // 2, W // 2
    lpad = _round_up(P, 8) if P > 0 else 0
    Hpad, Wpad = Hp + 2 * P, Wp + 2 * lpad

    # Free view (trailing-dims merge): adjacent W columns -> adjacent lane groups.
    x2 = x_nhwc.astype(jnp.bfloat16).reshape(B, H, Wp, 2 * Cp)

    # Explicit VMEM budget from the actual per-step footprint (+ headroom).
    out_isize = jnp.dtype(out_dtype).itemsize
    blk_bytes = (H * Wp * 2 * Cp * 2                # x block (bf16)
                 + Hp * Wp * Cp * out_isize         # out block
                 + K * K * Cp * Cp * 2              # weight taps (bf16)
                 + Cp * 4)                          # bias
    footprint = 2 * blk_bytes + Hpad * Wpad * Cp * 2
    vmem_limit = int(min(128 * 1024 * 1024,
                         max(32 * 1024 * 1024, 1.5 * footprint + (8 << 20))))

    flops = B * (3 * Hp * Wp * 2 * Cp                       # pooling adds/scale
                 + 2 * Hp * Wp * K * K * Cp * Cp            # conv MACs
                 + Hp * Wp * Cp)                            # bias add
    bytes_accessed = (x2.size * 2 + w_taps.size * 2 + b_row.size * 4
                      + B * Hp * Wp * Cp * out_isize)
    cost = pl.CostEstimate(flops=flops, transcendentals=0,
                           bytes_accessed=bytes_accessed)

    grid_spec = pltpu.PrefetchScalarGridSpec(
        num_scalar_prefetch=0,
        grid=(B,),
        in_specs=[
            pl.BlockSpec((None, H, Wp, 2 * Cp), lambda bi: (bi, 0, 0, 0)),  # x (per image)
            pl.BlockSpec((K, K, Cp, Cp), lambda bi: (0, 0, 0, 0)),          # taps (const)
            pl.BlockSpec((1, Cp), lambda bi: (0, 0)),                       # bias (const)
        ],
        out_specs=pl.BlockSpec((None, Hp, Wp, Cp), lambda bi: (bi, 0, 0, 0)),
        scratch_shapes=[pltpu.VMEM((Hpad, Wpad, Cp), jnp.bfloat16)],
    )
    return pl.pallas_call(
        functools.partial(_mpc_kernel, ksize=K, lpad=lpad),
        out_shape=jax.ShapeDtypeStruct((B, Hp, Wp, Cp), out_dtype),
        grid_spec=grid_spec,
        compiler_params=pltpu.CompilerParams(
            dimension_semantics=("parallel",),      # batch images independent
            vmem_limit_bytes=vmem_limit),
        cost_estimate=cost,
    )(x2, w_taps, b_row)


def mean_pool_conv(x_nchw, weight_oihw, bias=None):
    """MeanPoolConv.forward with PyTorch NCHW layout (compat wrapper).

    In a real NHWC pipeline keep activations NHWC / Cp-padded across layers and
    call mean_pool_conv_nhwc directly (and prepare_mean_pool_conv_params once):
    the transposes/pads below are HBM round trips done only for NCHW parity."""
    B, C, H, W = x_nchw.shape
    w_taps, b_row = prepare_mean_pool_conv_params(weight_oihw, bias)
    Cp = w_taps.shape[-1]
    x = jnp.transpose(x_nchw, (0, 2, 3, 1))
    if Cp != C:
        x = jnp.pad(x, ((0, 0), (0, 0), (0, 0), (0, Cp - C)))
    out = mean_pool_conv_nhwc(x, w_taps, b_row, out_dtype=jnp.float32)
    return jnp.transpose(out[:, :, :, :C], (0, 3, 1, 2))


# ----------------------- pure-JAX reference (sanity check) -----------------------
def _reference(x, w, b):
    p = (x[:, :, ::2, ::2] + x[:, :, 1::2, ::2]
         + x[:, :, ::2, 1::2] + x[:, :, 1::2, 1::2]) / 4.0
    pad = w.shape[-1] // 2
    o = lax.conv_general_dilated(p, w, (1, 1), [(pad, pad), (pad, pad)],
                                 dimension_numbers=("NCHW", "OIHW", "NCHW"))
    return o + b[None, :, None, None]


if __name__ == "__main__":
    key = jax.random.PRNGKey(0)
    kx, kw, kb = jax.random.split(key, 3)
    B, C, H, W = 2, 4, 16, 16
    x = jax.random.normal(kx, (B, C, H, W), jnp.float32)      # NCHW, like PyTorch
    w = 0.2 * jax.random.normal(kw, (C, C, 3, 3), jnp.float32)
    b = 0.05 * jax.random.normal(kb, (C,), jnp.float32)

    out = jax.block_until_ready(mean_pool_conv(x, w, b))
    assert out.shape == (B, C, H // 2, W // 2)

    ref = jax.block_until_ready(_reference(x, w, b))
    np.testing.assert_allclose(np.asarray(out), np.asarray(ref), rtol=3e-2, atol=3e-2)
    print("KERNEL_OK")
</pallas_src>

<mosaic_0001>
module attributes {stable_mosaic.version = 11 : i64} {
  func.func @_mpc_kernel(%arg0: i32, %arg1: memref<1x16x8x256xbf16, #tpu.memory_space<vmem>>, %arg2: memref<3x3x128x128xbf16, #tpu.memory_space<vmem>>, %arg3: memref<1x128xf32, #tpu.memory_space<vmem>>, %arg4: memref<1x8x8x128xf32, #tpu.memory_space<vmem>>, %arg5: memref<10x24x128xbf16, #tpu.memory_space<vmem>>) attributes {dimension_semantics = [#tpu.dimension_semantics<parallel>], iteration_bounds = array<i64: 2>, scalar_prefetch = 0 : i64, scratch_operands = 1 : i64, tpu.core_type = #tpu.core_type<tc>, window_params = [{transform_indices = @transform_0, window_bounds = array<i64: 1, 16, 8, 256>}, {pipeline_mode = #tpu.pipeline_mode<synchronous>, transform_indices = @transform_1, window_bounds = array<i64: 3, 3, 128, 128>}, {pipeline_mode = #tpu.pipeline_mode<synchronous>, transform_indices = @transform_2, window_bounds = array<i64: 1, 128>}, {transform_indices = @transform_3, window_bounds = array<i64: 1, 8, 8, 128>}]} {
    %c0 = arith.constant 0 : index
    %c0_0 = arith.constant 0 : index
    %c0_1 = arith.constant 0 : index
    %c0_2 = arith.constant 0 : index
    %0 = vector.load %arg1[%c0, %c0_0, %c0_1, %c0_2] : memref<1x16x8x256xbf16, #tpu.memory_space<vmem>>, vector<1x16x8x128xbf16>
    %1 = vector.shape_cast %0 : vector<1x16x8x128xbf16> to vector<16x8x128xbf16>
    %2 = arith.extf %1 : vector<16x8x128xbf16> to vector<16x8x128xf32>
    %c0_3 = arith.constant 0 : index
    %c0_4 = arith.constant 0 : index
    %c0_5 = arith.constant 0 : index
    %c128 = arith.constant 128 : index
    %3 = vector.load %arg1[%c0_3, %c0_4, %c0_5, %c128] : memref<1x16x8x256xbf16, #tpu.memory_space<vmem>>, vector<1x16x8x128xbf16>
    %4 = vector.shape_cast %3 : vector<1x16x8x128xbf16> to vector<16x8x128xbf16>
    %5 = arith.extf %4 : vector<16x8x128xbf16> to vector<16x8x128xf32>
    %6 = arith.addf %2, %5 : vector<16x8x128xf32>
    %7 = vector.shape_cast %6 : vector<16x8x128xf32> to vector<8x2x8x128xf32>
    %8 = vector.extract_strided_slice %7 {offsets = [0, 0, 0, 0], sizes = [8, 1, 8, 128], strides = [1, 1, 1, 1]} : vector<8x2x8x128xf32> to vector<8x1x8x128xf32>
    %9 = vector.shape_cast %8 : vector<8x1x8x128xf32> to vector<8x8x128xf32>
    %10 = vector.extract_strided_slice %7 {offsets = [0, 1, 0, 0], sizes = [8, 1, 8, 128], strides = [1, 1, 1, 1]} : vector<8x2x8x128xf32> to vector<8x1x8x128xf32>
    %11 = vector.shape_cast %10 : vector<8x1x8x128xf32> to vector<8x8x128xf32>
    %12 = arith.addf %9, %11 : vector<8x8x128xf32>
    %cst = arith.constant 2.500000e-01 : f32
    %13 = vector.broadcast %cst : f32 to vector<8x8x128xf32>
    %14 = arith.mulf %12, %13 : vector<8x8x128xf32>
    %cst_6 = arith.constant 0.000000e+00 : bf16
    %15 = vector.broadcast %cst_6 : bf16 to vector<1x24x128xbf16>
    %c0_7 = arith.constant 0 : index
    %c0_8 = arith.constant 0 : index
    %c0_9 = arith.constant 0 : index
    %16 = vector.load %arg5[%c0_7, %c0_8, %c0_9] : memref<10x24x128xbf16, #tpu.memory_space<vmem>>, vector<1x24x128xbf16>
    tpu.vector_store %arg5[%c0_7, %c0_8, %c0_9], %15 {strides = array<i32>} : memref<10x24x128xbf16, #tpu.memory_space<vmem>>, vector<1x24x128xbf16>,
    %cst_10 = arith.constant 0.000000e+00 : bf16
    %17 = vector.broadcast %cst_10 : bf16 to vector<1x24x128xbf16>
    %c9 = arith.constant 9 : index
    %c0_11 = arith.constant 0 : index
    %c0_12 = arith.constant 0 : index
    %18 = vector.load %arg5[%c9, %c0_11, %c0_12] : memref<10x24x128xbf16, #tpu.memory_space<vmem>>, vector<1x24x128xbf16>
    tpu.vector_store %arg5[%c9, %c0_11, %c0_12], %17 {strides = array<i32>} : memref<10x24x128xbf16, #tpu.memory_space<vmem>>, vector<1x24x128xbf16>,
    %cst_13 = arith.constant 0.000000e+00 : bf16
    %19 = vector.broadcast %cst_13 : bf16 to vector<8x8x128xbf16>
    %c1 = arith.constant 1 : index
    %c0_14 = arith.constant 0 : index
    %c0_15 = arith.constant 0 : index
    %20 = vector.load %arg5[%c1, %c0_14, %c0_15] : memref<10x24x128xbf16, #tpu.memory_space<vmem>>, vector<8x8x128xbf16>
    tpu.vector_store %arg5[%c1, %c0_14, %c0_15], %19 {strides = array<i32>} : memref<10x24x128xbf16, #tpu.memory_space<vmem>>, vector<8x8x128xbf16>,
    %cst_16 = arith.constant 0.000000e+00 : bf16
    %21 = vector.broadcast %cst_16 : bf16 to vector<8x8x128xbf16>
    %c1_17 = arith.constant 1 : index
    %c16 = arith.constant 16 : index
    %c0_18 = arith.constant 0 : index
    %22 = vector.load %arg5[%c1_17, %c16, %c0_18] : memref<10x24x128xbf16, #tpu.memory_space<vmem>>, vector<8x8x128xbf16>
    tpu.vector_store %arg5[%c1_17, %c16, %c0_18], %21 {strides = array<i32>} : memref<10x24x128xbf16, #tpu.memory_space<vmem>>, vector<8x8x128xbf16>,
    %23 = arith.truncf %14 : vector<8x8x128xf32> to vector<8x8x128xbf16>
    %c1_19 = arith.constant 1 : index
    %c8 = arith.constant 8 : index
    %c0_20 = arith.constant 0 : index
    %24 = vector.load %arg5[%c1_19, %c8, %c0_20] : memref<10x24x128xbf16, #tpu.memory_space<vmem>>, vector<8x8x128xbf16>
    tpu.vector_store %arg5[%c1_19, %c8, %c0_20], %23 {strides = array<i32>} : memref<10x24x128xbf16, #tpu.memory_space<vmem>>, vector<8x8x128xbf16>,
    %cst_21 = arith.constant 0.000000e+00 : f32
    %25 = vector.broadcast %cst_21 : f32 to vector<64x128xf32>
    %c0_22 = arith.constant 0 : index
    %c7 = arith.constant 7 : index
    %c0_23 = arith.constant 0 : index
    %26 = vector.load %arg5[%c0_22, %c7, %c0_23] : memref<10x24x128xbf16, #tpu.memory_space<vmem>>, vector<8x8x128xbf16>
    %27 = vector.shape_cast %26 : vector<8x8x128xbf16> to vector<64x128xbf16>
    %c0_24 = arith.constant 0 : index
    %c0_25 = arith.constant 0 : index
    %c0_26 = arith.constant 0 : index
    %c0_27 = arith.constant 0 : index
    %28 = vector.load %arg2[%c0_24, %c0_25, %c0_26, %c0_27] : memref<3x3x128x128xbf16, #tpu.memory_space<vmem>>, vector<1x1x128x128xbf16>
    %29 = vector.shape_cast %28 : vector<1x1x128x128xbf16> to vector<128x128xbf16>
    %cst_28 = arith.constant dense<0.000000e+00> : vector<64x128xf32>
    %30 = tpu.matmul %27, %29, %cst_28 {dimension_numbers = #tpu.dot_dimension_numbers<[1], [0], [0], [1], [0, 0, 1, 1], [], []>} : vector<64x128xbf16>, vector<128x128xbf16>, vector<64x128xf32> -> vector<64x128xf32>
    %31 = arith.addf %25, %30 : vector<64x128xf32>
    %c0_29 = arith.constant 0 : index
    %c8_30 = arith.constant 8 : index
    %c0_31 = arith.constant 0 : index
    %32 = vector.load %arg5[%c0_29, %c8_30, %c0_31] : memref<10x24x128xbf16, #tpu.memory_space<vmem>>, vector<8x8x128xbf16>
    %33 = vector.shape_cast %32 : vector<8x8x128xbf16> to vector<64x128xbf16>
    %c0_32 = arith.constant 0 : index
    %c1_33 = arith.constant 1 : index
    %c0_34 = arith.constant 0 : index
    %c0_35 = arith.constant 0 : index
    %34 = vector.load %arg2[%c0_32, %c1_33, %c0_34, %c0_35] : memref<3x3x128x128xbf16, #tpu.memory_space<vmem>>, vector<1x1x128x128xbf16>
    %35 = vector.shape_cast %34 : vector<1x1x128x128xbf16> to vector<128x128xbf16>
    %cst_36 = arith.constant dense<0.000000e+00> : vector<64x128xf32>
    %36 = tpu.matmul %33, %35, %cst_36 {dimension_numbers = #tpu.dot_dimension_numbers<[1], [0], [0], [1], [0, 0, 1, 1], [], []>} : vector<64x128xbf16>, vector<128x128xbf16>, vector<64x128xf32> -> vector<64x128xf32>
    %37 = arith.addf %31, %36 : vector<64x128xf32>
    %c0_37 = arith.constant 0 : index
    %c9_38 = arith.constant 9 : index
    %c0_39 = arith.constant 0 : index
    %38 = vector.load %arg5[%c0_37, %c9_38, %c0_39] : memref<10x24x128xbf16, #tpu.memory_space<vmem>>, vector<8x8x128xbf16>
    %39 = vector.shape_cast %38 : vector<8x8x128xbf16> to vector<64x128xbf16>
    %c0_40 = arith.constant 0 : index
    %c2 = arith.constant 2 : index
    %c0_41 = arith.constant 0 : index
    %c0_42 = arith.constant 0 : index
    %40 = vector.load %arg2[%c0_40, %c2, %c0_41, %c0_42] : memref<3x3x128x128xbf16, #tpu.memory_space<vmem>>, vector<1x1x128x128xbf16>
    %41 = vector.shape_cast %40 : vector<1x1x128x128xbf16> to vector<128x128xbf16>
    %cst_43 = arith.constant dense<0.000000e+00> : vector<64x128xf32>
    %42 = tpu.matmul %39, %41, %cst_43 {dimension_numbers = #tpu.dot_dimension_numbers<[1], [0], [0], [1], [0, 0, 1, 1], [], []>} : vector<64x128xbf16>, vector<128x128xbf16>, vector<64x128xf32> -> vector<64x128xf32>
    %43 = arith.addf %37, %42 : vector<64x128xf32>
    %c1_44 = arith.constant 1 : index
    %c7_45 = arith.constant 7 : index
    %c0_46 = arith.constant 0 : index
    %44 = vector.load %arg5[%c1_44, %c7_45, %c0_46] : memref<10x24x128xbf16, #tpu.memory_space<vmem>>, vector<8x8x128xbf16>
    %45 = vector.shape_cast %44 : vector<8x8x128xbf16> to vector<64x128xbf16>
    %c1_47 = arith.constant 1 : index
    %c0_48 = arith.constant 0 : index
    %c0_49 = arith.constant 0 : index
    %c0_50 = arith.constant 0 : index
    %46 = vector.load %arg2[%c1_47, %c0_48, %c0_49, %c0_50] : memref<3x3x128x128xbf16, #tpu.memory_space<vmem>>, vector<1x1x128x128xbf16>
    %47 = vector.shape_cast %46 : vector<1x1x128x128xbf16> to vector<128x128xbf16>
    %cst_51 = arith.constant dense<0.000000e+00> : vector<64x128xf32>
    %48 = tpu.matmul %45, %47, %cst_51 {dimension_numbers = #tpu.dot_dimension_numbers<[1], [0], [0], [1], [0, 0, 1, 1], [], []>} : vector<64x128xbf16>, vector<128x128xbf16>, vector<64x128xf32> -> vector<64x128xf32>
    %49 = arith.addf %43, %48 : vector<64x128xf32>
    %c1_52 = arith.constant 1 : index
    %c8_53 = arith.constant 8 : index
    %c0_54 = arith.constant 0 : index
    %50 = vector.load %arg5[%c1_52, %c8_53, %c0_54] : memref<10x24x128xbf16, #tpu.memory_space<vmem>>, vector<8x8x128xbf16>
    %51 = vector.shape_cast %50 : vector<8x8x128xbf16> to vector<64x128xbf16>
    %c1_55 = arith.constant 1 : index
    %c1_56 = arith.constant 1 : index
    %c0_57 = arith.constant 0 : index
    %c0_58 = arith.constant 0 : index
    %52 = vector.load %arg2[%c1_55, %c1_56, %c0_57, %c0_58] : memref<3x3x128x128xbf16, #tpu.memory_space<vmem>>, vector<1x1x128x128xbf16>
    %53 = vector.shape_cast %52 : vector<1x1x128x128xbf16> to vector<128x128xbf16>
    %cst_59 = arith.constant dense<0.000000e+00> : vector<64x128xf32>
    %54 = tpu.matmul %51, %53, %cst_59 {dimension_numbers = #tpu.dot_dimension_numbers<[1], [0], [0], [1], [0, 0, 1, 1], [], []>} : vector<64x128xbf16>, vector<128x128xbf16>, vector<64x128xf32> -> vector<64x128xf32>
    %55 = arith.addf %49, %54 : vector<64x128xf32>
    %c1_60 = arith.constant 1 : index
    %c9_61 = arith.constant 9 : index
    %c0_62 = arith.constant 0 : index
    %56 = vector.load %arg5[%c1_60, %c9_61, %c0_62] : memref<10x24x128xbf16, #tpu.memory_space<vmem>>, vector<8x8x128xbf16>
    %57 = vector.shape_cast %56 : vector<8x8x128xbf16> to vector<64x128xbf16>
    %c1_63 = arith.constant 1 : index
    %c2_64 = arith.constant 2 : index
    %c0_65 = arith.constant 0 : index
    %c0_66 = arith.constant 0 : index
    %58 = vector.load %arg2[%c1_63, %c2_64, %c0_65, %c0_66] : memref<3x3x128x128xbf16, #tpu.memory_space<vmem>>, vector<1x1x128x128xbf16>
    %59 = vector.shape_cast %58 : vector<1x1x128x128xbf16> to vector<128x128xbf16>
    %cst_67 = arith.constant dense<0.000000e+00> : vector<64x128xf32>
    %60 = tpu.matmul %57, %59, %cst_67 {dimension_numbers = #tpu.dot_dimension_numbers<[1], [0], [0], [1], [0, 0, 1, 1], [], []>} : vector<64x128xbf16>, vector<128x128xbf16>, vector<64x128xf32> -> vector<64x128xf32>
    %61 = arith.addf %55, %60 : vector<64x128xf32>
    %c2_68 = arith.constant 2 : index
    %c7_69 = arith.constant 7 : index
    %c0_70 = arith.constant 0 : index
    %62 = vector.load %arg5[%c2_68, %c7_69, %c0_70] : memref<10x24x128xbf16, #tpu.memory_space<vmem>>, vector<8x8x128xbf16>
    %63 = vector.shape_cast %62 : vector<8x8x128xbf16> to vector<64x128xbf16>
    %c2_71 = arith.constant 2 : index
    %c0_72 = arith.constant 0 : index
    %c0_73 = arith.constant 0 : index
    %c0_74 = arith.constant 0 : index
    %64 = vector.load %arg2[%c2_71, %c0_72, %c0_73, %c0_74] : memref<3x3x128x128xbf16, #tpu.memory_space<vmem>>, vector<1x1x128x128xbf16>
    %65 = vector.shape_cast %64 : vector<1x1x128x128xbf16> to vector<128x128xbf16>
    %cst_75 = arith.constant dense<0.000000e+00> : vector<64x128xf32>
    %66 = tpu.matmul %63, %65, %cst_75 {dimension_numbers = #tpu.dot_dimension_numbers<[1], [0], [0], [1], [0, 0, 1, 1], [], []>} : vector<64x128xbf16>, vector<128x128xbf16>, vector<64x128xf32> -> vector<64x128xf32>
    %67 = arith.addf %61, %66 : vector<64x128xf32>
    %c2_76 = arith.constant 2 : index
    %c8_77 = arith.constant 8 : index
    %c0_78 = arith.constant 0 : index
    %68 = vector.load %arg5[%c2_76, %c8_77, %c0_78] : memref<10x24x128xbf16, #tpu.memory_space<vmem>>, vector<8x8x128xbf16>
    %69 = vector.shape_cast %68 : vector<8x8x128xbf16> to vector<64x128xbf16>
    %c2_79 = arith.constant 2 : index
    %c1_80 = arith.constant 1 : index
    %c0_81 = arith.constant 0 : index
    %c0_82 = arith.constant 0 : index
    %70 = vector.load %arg2[%c2_79, %c1_80, %c0_81, %c0_82] : memref<3x3x128x128xbf16, #tpu.memory_space<vmem>>, vector<1x1x128x128xbf16>
    %71 = vector.shape_cast %70 : vector<1x1x128x128xbf16> to vector<128x128xbf16>
    %cst_83 = arith.constant dense<0.000000e+00> : vector<64x128xf32>
    %72 = tpu.matmul %69, %71, %cst_83 {dimension_numbers = #tpu.dot_dimension_numbers<[1], [0], [0], [1], [0, 0, 1, 1], [], []>} : vector<64x128xbf16>, vector<128x128xbf16>, vector<64x128xf32> -> vector<64x128xf32>
    %73 = arith.addf %67, %72 : vector<64x128xf32>
    %c2_84 = arith.constant 2 : index
    %c9_85 = arith.constant 9 : index
    %c0_86 = arith.constant 0 : index
    %74 = vector.load %arg5[%c2_84, %c9_85, %c0_86] : memref<10x24x128xbf16, #tpu.memory_space<vmem>>, vector<8x8x128xbf16>
    %75 = vector.shape_cast %74 : vector<8x8x128xbf16> to vector<64x128xbf16>
    %c2_87 = arith.constant 2 : index
    %c2_88 = arith.constant 2 : index
    %c0_89 = arith.constant 0 : index
    %c0_90 = arith.constant 0 : index
    %76 = vector.load %arg2[%c2_87, %c2_88, %c0_89, %c0_90] : memref<3x3x128x128xbf16, #tpu.memory_space<vmem>>, vector<1x1x128x128xbf16>
    %77 = vector.shape_cast %76 : vector<1x1x128x128xbf16> to vector<128x128xbf16>
    %cst_91 = arith.constant dense<0.000000e+00> : vector<64x128xf32>
    %78 = tpu.matmul %75, %77, %cst_91 {dimension_numbers = #tpu.dot_dimension_numbers<[1], [0], [0], [1], [0, 0, 1, 1], [], []>} : vector<64x128xbf16>, vector<128x128xbf16>, vector<64x128xf32> -> vector<64x128xf32>
    %79 = arith.addf %73, %78 : vector<64x128xf32>
    %c0_92 = arith.constant 0 : index
    %c0_93 = arith.constant 0 : index
    %80 = vector.load %arg3[%c0_92, %c0_93] : memref<1x128xf32, #tpu.memory_space<vmem>>, vector<1x128xf32>
    %81 = vector.broadcast %80 : vector<1x128xf32> to vector<64x128xf32>
    %82 = arith.addf %79, %81 : vector<64x128xf32>
    %83 = vector.shape_cast %82 : vector<64x128xf32> to vector<8x8x128xf32>
    %c0_94 = arith.constant 0 : index
    %c0_95 = arith.constant 0 : index
    %c0_96 = arith.constant 0 : index
    %c0_97 = arith.constant 0 : index
    %84 = vector.load %arg4[%c0_94, %c0_95, %c0_96, %c0_97] : memref<1x8x8x128xf32, #tpu.memory_space<vmem>>, vector<1x8x8x128xf32>
    %85 = vector.shape_cast %84 : vector<1x8x8x128xf32> to vector<8x8x128xf32>
    %86 = vector.shape_cast %83 : vector<8x8x128xf32> to vector<1x8x8x128xf32>
    tpu.vector_store %arg4[%c0_94, %c0_95, %c0_96, %c0_97], %86 {strides = array<i32>} : memref<1x8x8x128xf32, #tpu.memory_space<vmem>>, vector<1x8x8x128xf32>,
    return
  }
  func.func @transform_0(%arg0: i32) -> (i32, i32, i32, i32) {
    %c0_i32 = arith.constant 0 : i32
    %c0_i32_0 = arith.constant 0 : i32
    %c0_i32_1 = arith.constant 0 : i32
    %c0_i32_2 = arith.constant 0 : i32
    return %arg0, %c0_i32, %c0_i32_0, %c0_i32_1 : i32, i32, i32, i32
  }
  func.func @transform_1(%arg0: i32) -> (i32, i32, i32, i32) {
    %c0_i32 = arith.constant 0 : i32
    %c0_i32_0 = arith.constant 0 : i32
    %c0_i32_1 = arith.constant 0 : i32
    %c0_i32_2 = arith.constant 0 : i32
    %c0_i32_3 = arith.constant 0 : i32
    return %c0_i32, %c0_i32_0, %c0_i32_1, %c0_i32_2 : i32, i32, i32, i32
  }
  func.func @transform_2(%arg0: i32) -> (i32, i32) {
    %c0_i32 = arith.constant 0 : i32
    %c0_i32_0 = arith.constant 0 : i32
    %c0_i32_1 = arith.constant 0 : i32
    return %c0_i32, %c0_i32_0 : i32, i32
  }
  func.func @transform_3(%arg0: i32) -> (i32, i32, i32, i32) {
    %c0_i32 = arith.constant 0 : i32
    %c0_i32_0 = arith.constant 0 : i32
    %c0_i32_1 = arith.constant 0 : i32
    %c0_i32_2 = arith.constant 0 : i32
    return %arg0, %c0_i32, %c0_i32_0, %c0_i32_1 : i32, i32, i32, i32
  }
}

</mosaic_0001>

<bundles_post_ra>
// kernel: tpu_custom_call.1
= control target key start
LH: loop header
LB: loop body
LE: loop exit
PB: predicated region body
PF: predicated region fallthrough
CT: control target
= control target key end

     0   :  { %8 = vsyncpa [#allocation4], 0  ;;  %s4053_s0 = inlined_call_operand.hbm [shape: bf16[2,16,8,256], index: 0, kind: input, shape index: {}]   ;;  %s4054_s1 = inlined_call_operand.hbm [shape: bf16[3,3,128,128], index: 1, kind: input, shape index: {}]   ;;  %s4055_s2 = inlined_call_operand.vmem [shape: f32[1,128], index: 2, kind: input, shape index: {}]   ;;  %s4056_s3 = inlined_call_operand.hbm [shape: f32[2,8,8,128], index: 3, kind: output, shape index: {}]  }
   0x1   :  { %10 = vsyncpa [#allocation4 + $0x1], 0 }
   0x2   :  { %11 = vsyncpa [#allocation7], 0 }
   0x3   :  { %12 = vsyncpa [#allocation5], 0 }
   0x4   :  { %14 = vsyncpa [#allocation5 + $0x1], 0  ;;  %s3468_s12 = smov 0   ;;  %s3470_s13 = smov 0  }
   0x5   :  { %s3472_s14 = smov 0   ;;  %s3474_s15 = smov 0  }
   0x6 LB: > { %s3489_s16 = sadd.s32 4294967295, %s3436_s15   ;;  %s2605_s17 = sadd.s32 4294967294, %s3436_s15   ;;  %s3436_s15 = sphi %s3474_s15, %s4081_s15   ;;  %s3432_s14 = sphi %s3472_s14, %s4080_s14   ;;  %s3428_s13 = sphi %s3470_s13, %s4079_s13   ;;  %s3424_s12 = sphi %s3468_s12, %s4078_s12  }
   0x7   : > { %p40_p0 = scmp.ne.s32.totalorder %s3428_s13, %s3424_s12  ;;  %p4057_p1 = scmp.eq.s32.totalorder %s3489_s16, 0 }
   0x8   : > { %p112_p3 = scmp.eq.s32.totalorder %s2605_s17, 1  ;;  %p2606_p5 = scmp.ge.s32.totalorder %s3436_s15, 1 }
   0x9   : > { %p3498_p4 = por %p4057_p1, %p40_p0  ;;  %p119_p7 = scmp.lt.s32.totalorder %s3436_s15, 3 }
   0xa   : > { %p3503_p6 = por %p112_p3, %p40_p0  ;;  %s3438_s21 = smov [#allocation6]  }
   0xb   : > { %s4060_s18 = scalar_select %p3498_p4, 1, 0 }
   0xc   : > { %s4061_s19 = scalar_select %p3503_p6, 1, 0 }
   0xd   : > { %p3508_p8 = pnand %p2606_p5, %p119_p7  ;;  %s131_s22 = sshll.u32 %s3438_s21, 4  ;;  %s3512_s22 = int_to_ptr.vmem [resolvable:$true] %s131_s22 }
   0xe   : > { %s3524_s24 = sadd.s32 1, %s3436_s15   ;;  %s27_s25 = sadd.s32 1, %s3432_s14 }
   0xf   : > { %s4062_s20 = scalar_select %p3508_p8, 1, 0 }
  0x10   : > { %p3168_p9 = pneg %p3508_p8  ;;  %s24_s26 = ssub.s32 %s3436_s15, %s3524_s24 }
  0x11   : > { %s3308_s29 = scalar_lea.hbm %s4054_s1, 9216 }
  0x12   : > { %p3519_p11 = pnand %p3168_p9, %p4057_p1  ;;  %p3309_p12 = scmp.ne.s32.totalorder %s4054_s1, %s3308_s29 }
  0x13   : > { %p3315_p5 = scmp.lt.u32.totalorder %s3308_s29, %s4054_s1 }
  0x14   : > { %p3310_p13 = pneg %p3519_p11 }
  0x16   : > { %p3311_p0 = pnand %p3310_p13, %p3309_p12 }
  0x18   : > { %p3312_p3 = pneg %p3311_p0 }
  0x1a   : > { %p3317_p7 = pnand %p3315_p5, %p3312_p3 }
  0x1c   : > { %3320 = shalt.err (!%p3317_p7)
}
  0x1d   : > { %s3321_s7 = scalar_lea.vmem %s3512_s22, 9216  ;;  %p3329_p2 = scmp.lt.s32.totalorder %s3512_s22, %s3512_s22 }
  0x1e   : > { %p3322_p9 = scmp.ne.s32.totalorder %s3512_s22, %s3321_s7  ;;  %p3330_p6 = scmp.lt.s32.totalorder %s3321_s7, %s3321_s7 }
  0x20   : > { %p3324_p10 = pnand %p3322_p9, %p3310_p13  ;;  %p3331_p4 = por %p3330_p6, %p3329_p2 }
  0x22   : > { %p3325_p1 = pneg %p3324_p10 }
  0x24   : > { %p3332_p8 = pnand %p3331_p4, %p3325_p1 }
  0x26   : > { %3335 = shalt.err (!%p3332_p8)
}
  0x27   : > { %s3439_s8 = smov 64   ;;  %s3440_s9 = smov 4  }
  0x28   : > { %3171 = dma.hbm_to_vmem [thread:$0]  (!%p3519_p11), %s4054_s1, 9216, %s3512_s22, [#allocation7], %s3439_s8, %s3439_s8, %s3440_s9  }
  0x29   : > { %p25_p2 = scmp.eq.s32.totalorder %s24_s26, 0  ;;  %p34_p1 = scmp.ne.s32.totalorder %s3432_s14, %s3428_s13 }
  0x2a   : > { %p35_p4 = scmp.eq.s32.totalorder %s3436_s15, 0  ;;  %p3181_p6 = scmp.lt.s32.totalorder %s3436_s15, 2 }
  0x2b   : > { %s3555_s17 = scalar_select %p25_p2, %s3432_s14, %s27_s25  }
  0x2c   : > { %p36_p8 = por %p35_p4, %p34_p1  ;;  %p4064_p10 = scmp.eq.s32.totalorder %s3489_s16, 1 }
  0x2d   : > { %s148_s27 = sand.u32 1, %s3432_s14   ;;  %s2754_s28 = sshll.u32 %s3436_s15, 11 }
  0x2e   : > { %p3559_p12 = por %p4064_p10, %p34_p1  ;;  %s2609_s29 = sshll.u32 %s148_s27, 7 }
  0x2f   : > { %s3568_s4 = scalar_lea.hbm %s4053_s0, %s2754_s28  ;;  %s152_s22 = scalar_lea.vmem [#allocation3], %s2609_s29 }
  0x30   : > { %s159_s25 = sshll.u32 %s152_s22, 4  ;;  %p3570_p11 = pnand %p3181_p6, %p36_p8  ;;  %s3574_s25 = int_to_ptr.vmem [resolvable:$true] %s159_s25 }
  0x31   : > { %s3576_s5 = scalar_lea.sflag [#allocation4], %s148_s27  ;;  %s3336_s6 = scalar_lea.hbm %s3568_s4, 2048 }
  0x32   : > { %p3337_p13 = scmp.ne.s32.totalorder %s3568_s4, %s3336_s6  ;;  %p3338_p0 = pneg %p3570_p11 }
  0x33   : > { %s3341_s9 = scalar_lea.hbm %s4053_s0, 4096  ;;  %p3342_p7 = scmp.lt.u32.totalorder %s3568_s4, %s4053_s0 }
  0x34   : > { %p3339_p3 = pnand %p3338_p0, %p3337_p13  ;;  %p3343_p9 = scmp.lt.u32.totalorder %s3341_s9, %s3336_s6 }
  0x35   : > { %p3345_p1 = scmp.lt.u32.totalorder %s3336_s6, %s3568_s4 }
  0x36   : > { %p3340_p5 = pneg %p3339_p3  ;;  %p3344_p2 = por %p3343_p9, %p3342_p7 }
  0x38   : > { %p3346_p4 = por %p3345_p1, %p3344_p2 }
  0x3a   : > { %p3347_p6 = pnand %p3346_p4, %p3340_p5 }
  0x3c   : > { %3350 = shalt.err (!%p3347_p6)
}
  0x3d   : > { %s3351_s27 = scalar_lea.vmem %s3574_s25, 2048  ;;  %s3441_s28 = smov [#allocation3]  }
  0x3e   : > { %p3352_p8 = scmp.ne.s32.totalorder %s3574_s25, %s3351_s27  ;;  %s3356_s29 = sshll.u32 %s3441_s28, 4  ;;  %s3357_s29 = int_to_ptr.vmem [resolvable:$false] %s3356_s29 }
  0x3f   : > { %s3358_s23 = scalar_lea.vmem %s3357_s29, 4096  ;;  %p3359_p3 = scmp.lt.s32.totalorder %s3574_s25, %s3357_s29 }
  0x40   : > { %p3354_p10 = pnand %p3352_p8, %p3338_p0  ;;  %p3360_p7 = scmp.lt.s32.totalorder %s3358_s23, %s3351_s27 }
  0x42   : > { %p3355_p13 = pneg %p3354_p10  ;;  %p3361_p9 = por %p3360_p7, %p3359_p3 }
  0x44   : > { %p3362_p2 = pnand %p3361_p9, %p3355_p13 }
  0x46   : > { %3365 = shalt.err (!%p3362_p2)
}
  0x47   : > { %s3442_s30 = smov 128   ;;  %s3443_s22 = smov 8  }
  0x48   : > { %3175 = dma.hbm_to_vmem [thread:$0]  (!%p3570_p11), %s3568_s4, 2048, %s3574_s25, %s3576_s5, %s3442_s30, %s3442_s30, %s3443_s22  }
  0x49   : > { %p4067_p0 = scmp.ne.s32.totalorder %s4062_s20, 0 }
  0x4a   : > { %s3607_s6 = sand.u32 (!%p4067_p0), 1, %s3428_s13   ;;  %p4068_p5 = scmp.ne.s32.totalorder (!%p4067_p0), %s4060_s18, 0 }
  0x4b   : > { %171 = sbr.rel (%p4067_p0) target bundleno = 483 (0x1e3), region = 32  ;;  %s2613_s7 = sshll.u32 (!%p4067_p0), %s3607_s6, 7 }
  0x4c   : > { %s174_s8 = scalar_lea.sflag (!%p4067_p0), [#allocation4], %s3607_s6  ;;  %s3611_s9 = scalar_lea.vmem (!%p4067_p0), [#allocation3], %s2613_s7 }
  0x52   : > { %3411 = dma.done.wait (%p4068_p5), %s174_s8, 2048  }
  0x53   : > { %3413 = vsyncadd (%p4068_p5), %s174_s8, 4294965248  ;;  %p4069_p11 = scmp.eq.s32.totalorder %s3489_s16, 0 }
  0x55   : > { %3415 = dma.done.wait (%p4069_p11), [#allocation7], 9216   ;;  %p4070_p1 = pmov %p4069_p11 }
  0x56   : > { %v3444_v0 = vmov 0   ;;  %v3224_v1 = vld [vmem:[#allocation6 + $0x40] sm:$0xff]   ;;  %v3226_v3 = vld [vmem:[#allocation6 + $0x48] sm:$0xff]   ;;  %v3228_v5 = vld [vmem:[#allocation6 + $0x50] sm:$0xff]   ;;  %vm357_vm0 = vsmask.f32 256 }
  0x57   : > { %3417 = vsyncadd (%p4070_p1), [#allocation7], 4294958080  ;;  %302 = vst [vmem:[#allocation2 + $0x4] sm:$0xf] %v3444_v0  ;;  %v3225_v2 = vld [vmem:[#allocation6 + $0x100] sm:$0xff]   ;;  %2864 = vmatprep.subr.bf16.mxu1 %v3224_v1  ;;  %v3227_v4 = vld [vmem:[#allocation6 + $0x108] sm:$0xff]  }
  0x58   : > { %301 = vst [vmem:[#allocation2] sm:$0xf] %v3444_v0  ;;  %303 = vst [vmem:[#allocation2 + $0x8] sm:$0xf] %v3444_v0  ;;  %2960 = vmatprep.subr.bf16.mxu0 %v3225_v2  ;;  %2865 = vmatpush3.bf16.msra.mxu1 %v3224_v1  ;;  %v3229_v6 = vld [vmem:[#allocation6 + $0x110] sm:$0xff]   ;;  %v3230_v7 = vld [vmem:[#allocation6 + $0x58] sm:$0xff]  }
  0x59   : > { %305 = vst [vmem:[#allocation2 + $0x6c] sm:$0xf] %v3444_v0  ;;  %306 = vst [vmem:[#allocation2 + $0x70] sm:$0xf] %v3444_v0  ;;  %2961 = vmatpush3.bf16.msra.mxu0 %v3225_v2  ;;  %2866 = vmatprep.subr.bf16.mxu1 %v3226_v3  ;;  %v3231_v8 = vld [vmem:[#allocation6 + $0x118] sm:$0xff]   ;;  %v3232_v9 = vld [vmem:[#allocation6 + $0x60] sm:$0xff]  }
  0x5a   : > { %307 = vst [vmem:[#allocation2 + $0x74] sm:$0xf] %v3444_v0  ;;  %309 = vst [vmem:[#allocation2 + $0xc] sm:$0xf] %v3444_v0  ;;  %2962 = vmatprep.subr.bf16.mxu0 %v3227_v4  ;;  %v3233_v10 = vld [vmem:[#allocation6 + $0x120] sm:$0xff]   ;;  %v3234_v11 = vld [vmem:[#allocation6 + $0x68] sm:$0xff]  }
  0x5b   : > { %310 = vst [vmem:[#allocation2 + $0x18] sm:$0xf] %v3444_v0  ;;  %311 = vst [vmem:[#allocation2 + $0x24] sm:$0xf] %v3444_v0  ;;  %v205_v12 = vld [vmem:[%s3611_s9] sm:$0xff]   ;;  %v206_v13 = vld [vmem:[%s3611_s9 + $0x8] sm:$0xff]  }
  0x5c   : > { %312 = vst [vmem:[#allocation2 + $0x30] sm:$0xf] %v3444_v0  ;;  %313 = vst [vmem:[#allocation2 + $0x3c] sm:$0xf] %v3444_v0  ;;  %2867 = vmatpush3.bf16.msra.mxu1 %v3226_v3  ;;  %v3235_v14 = vld [vmem:[#allocation6 + $0x128] sm:$0xff]   ;;  %v221_v15 = vunpack.c.l.bf16 %v205_v12  ;;  %v222_v16 = vunpack.c.l.bf16 %v206_v13  ;;  %v253_v17 = vunpack.c.h.bf16 %v205_v12  ;;  %v254_v18 = vunpack.c.h.bf16 %v206_v13  ;;  %v207_v19 = vld [vmem:[%s3611_s9 + $0x10] sm:$0xff]  }
  0x5d   : > { %314 = vst [vmem:[#allocation2 + $0x48] sm:$0xf] %v3444_v0  ;;  %315 = vst [vmem:[#allocation2 + $0x54] sm:$0xf] %v3444_v0  ;;  %2963 = vmatpush3.bf16.msra.mxu0 %v3227_v4  ;;  %2868 = vmatprep.subr.bf16.mxu1 %v3228_v5  ;;  %v208_v20 = vld [vmem:[%s3611_s9 + $0x18] sm:$0xff]   ;;  %v3236_v21 = vld [vmem:[#allocation6 + $0x70] sm:$0xff]   ;;  %v223_v24 = vunpack.c.l.bf16 %v207_v19  ;;  %v255_v27 = vunpack.c.h.bf16 %v207_v19 }
  0x5e   : > { %316 = vst [vmem:[#allocation2 + $0x60] sm:$0xf] %v3444_v0  ;;  %317 = vst [vmem:[#allocation2 + $0x14] sm:$0xf] %v3444_v0  ;;  %2964 = vmatprep.subr.bf16.mxu0 %v3229_v6  ;;  %v269_v22 = vadd.f32 %v253_v17, %v221_v15  ;;  %v270_v23 = vadd.f32 %v254_v18, %v222_v16  ;;  %v224_v25 = vunpack.c.l.bf16 %v208_v20  ;;  %v209_v26 = vld [vmem:[%s3611_s9 + $0x20] sm:$0xff]   ;;  %v256_v28 = vunpack.c.h.bf16 %v208_v20  ;;  %v210_v29 = vld [vmem:[%s3611_s9 + $0x28] sm:$0xff]  }
  0x5f   : > { %318 = vst [vmem:[#allocation2 + $0x20] sm:$0xf] %v3444_v0  ;;  %319 = vst [vmem:[#allocation2 + $0x2c] sm:$0xf] %v3444_v0  ;;  %v225_v30 = vunpack.c.l.bf16 %v209_v26  ;;  %v211_v31 = vld [vmem:[%s3611_s9 + $0x30] sm:$0xff]   ;;  %v212_v32 = vld [vmem:[%s3611_s9 + $0x38] sm:$0xff]   ;;  %v226_v35 = vunpack.c.l.bf16 %v210_v29  ;;  %v257_v36 = vunpack.c.h.bf16 %v209_v26  ;;  %v258_v37 = vunpack.c.h.bf16 %v210_v29 }
  0x60   : > { %320 = vst [vmem:[#allocation2 + $0x38] sm:$0xf] %v3444_v0  ;;  %321 = vst [vmem:[#allocation2 + $0x44] sm:$0xf] %v3444_v0  ;;  %2869 = vmatpush3.bf16.msra.mxu1 %v3228_v5  ;;  %v3237_v33 = vld [vmem:[#allocation6 + $0x130] sm:$0xff]   ;;  %v285_v34 = vadd.f32 %v270_v23, %v269_v22  ;;  %v271_v38 = vadd.f32 %v255_v27, %v223_v24  ;;  %v272_v39 = vadd.f32 %v256_v28, %v224_v25  ;;  %v3238_v45 = vld [vmem:[#allocation6 + $0x78] sm:$0xff]  }
  0x61   : > { %322 = vst [vmem:[#allocation2 + $0x50] sm:$0xf] %v3444_v0  ;;  %323 = vst [vmem:[#allocation2 + $0x5c] sm:$0xf] %v3444_v0  ;;  %2965 = vmatpush3.bf16.msra.mxu0 %v3229_v6  ;;  %2870 = vmatprep.subr.bf16.mxu1 %v3230_v7  ;;  %v227_v40 = vunpack.c.l.bf16 %v211_v31  ;;  %v273_v42 = vadd.f32 %v257_v36, %v225_v30  ;;  %v274_v43 = vadd.f32 %v258_v37, %v226_v35  ;;  %v3239_v49 = vld [vmem:[#allocation6 + $0x138] sm:$0xff]   ;;  %v3629_v56 = vld [vmem:[#allocation6] sm:$0xff]  }
  0x62   : > { %324 = vst [vmem:[#allocation2 + $0x68] sm:$0xf] %v3444_v0  ;;  %2966 = vmatprep.subr.bf16.mxu0 %v3231_v8  ;;  %v293_v41 = vmul.f32 0.25, %v285_v34  ;;  %v228_v44 = vunpack.c.l.bf16 %v212_v32  ;;  %v286_v46 = vadd.f32 %v272_v39, %v271_v38  ;;  %v259_v47 = vunpack.c.h.bf16 %v211_v31  ;;  %v3631_v59 = vld [vmem:[#allocation2 + $0x4] sm:$0xf]  ;;  %v3633_v60 = vld [vmem:[#allocation6 + $0x140] sm:$0xff]  }
  0x63   : > { %v260_v48 = vunpack.c.h.bf16 %v212_v32  ;;  %v287_v51 = vadd.f32 %v274_v43, %v273_v42  ;;  %v213_v63 = vld [vmem:[%s3611_s9 + $0x40] sm:$0xff]   ;;  %v214_v0 = vld [vmem:[%s3611_s9 + $0x48] sm:$0xff]   ;;  %v366_v1 = vshrl.u32 %v3631_v59, 16  ;;  %v215_v3 = vld [vmem:[%s3611_s9 + $0x50] sm:$0xff]   ;;  %vm358_vm1 = vsmask.f32 4368 }
  0x64   : > { %2871 = vmatpush3.bf16.msra.mxu1 %v3230_v7  ;;  %v325_v50 = vpack.c.bf16 %v293_v41, %v293_v41  ;;  %v294_v52 = vmul.f32 0.25, %v286_v46  ;;  %v275_v53 = vadd.f32 %v259_v47, %v227_v40  ;;  %v229_v4 = vunpack.c.l.bf16 %v213_v63  ;;  %v217_v24 = vld [vmem:[%s3611_s9 + $0x60] sm:$0xff]   ;;  %v218_v30 = vld [vmem:[%s3611_s9 + $0x68] sm:$0xff]   ;;  %vm3717_vm4 = vmor %vm357_vm0, %vm358_vm1  ;;  %s2615_s18 = sshll.u32 %s3607_s6, 6  ;;  %s2755_s5 = sshll.u32 %s3489_s16, 10 }
  0x65   : > { %2967 = vmatpush3.bf16.msra.mxu0 %v3231_v8  ;;  %2872 = vmatprep.subr.bf16.mxu1 %v3232_v9  ;;  %v276_v54 = vadd.f32 %v260_v48, %v228_v44  ;;  %v295_v55 = vmul.f32 0.25, %v287_v51  ;;  %v230_v5 = vunpack.c.l.bf16 %v214_v0  ;;  %v261_v6 = vunpack.c.h.bf16 %v213_v63  ;;  %v216_v8 = vld [vmem:[%s3611_s9 + $0x58] sm:$0xff]   ;;  %v3247_v44 = vld [vmem:[#allocation6 + $0x148] sm:$0xff]   ;;  %v3248_v51 = vld [vmem:[#allocation6 + $0x10] sm:$0xff]   ;;  %s203_s25 = scalar_lea.vmem [#allocation8], %s2615_s18  ;;  %s4009_s11 = scalar_lea.hbm %s4056_s3, %s2755_s5 }
  0x66   : > { %2968 = vmatprep.subr.bf16.mxu0 %v3233_v10  ;;  %333 = vst [vmem:[#allocation2 + $0x10] sm:$0xf] %v325_v50  ;;  %v326_v57 = vpack.c.bf16 %v294_v52, %v294_v52  ;;  %v262_v7 = vunpack.c.h.bf16 %v214_v0  ;;  %v263_v15 = vunpack.c.h.bf16 %v215_v3  ;;  %v264_v16 = vunpack.c.h.bf16 %v216_v8  ;;  %v219_v52 = vld [vmem:[%s3611_s9 + $0x70] sm:$0xff]   ;;  %s2522_s26 = sshll.u32 %s203_s25, 4  ;;  %s2509_s27 = scalar_lea.sflag [#allocation5], %s3607_s6  ;;  %s4004_s26 = int_to_ptr.vmem [resolvable:$true] %s2522_s26 }
  0x67   : > { %v288_v58 = vadd.f32 %v276_v54, %v275_v53  ;;  %v327_v61 = vpack.c.bf16 %v295_v55, %v295_v55  ;;  %v3651_v19 = vrot.slane %v366_v1, 7  ;;  %v277_v22 = vadd.f32 %v261_v6, %v229_v4  ;;  %v341_v4 = vld [vmem:[#allocation2] sm:$0x8]  ;;  %s3366_s28 = scalar_lea.vmem %s4004_s26, 1024  ;;  %s3445_s29 = smov [#allocation8]  }
  0x68   : > { %2873 = vmatpush3.bf16.msra.mxu1 %v3232_v9  ;;  %334 = vst [vmem:[#allocation2 + $0x1c] sm:$0xf] %v326_v57  ;;  %v278_v23 = vadd.f32 %v262_v7, %v230_v5  ;;  %v233_v40 = vunpack.c.l.bf16 %v217_v24  ;;  %v234_v46 = vunpack.c.l.bf16 %v218_v30  ;;  %v343_v5 = vld [vmem:[#allocation2 + $0xc] sm:$0x8]  ;;  %vm779_vm2 = vsmask.f32 3328  ;;  %p3367_p4 = scmp.ne.s32.totalorder %s4004_s26, %s3366_s28 }
  0x69   : > { %2969 = vmatpush3.bf16.msra.mxu0 %v3233_v10  ;;  %2874 = vmatprep.subr.bf16.mxu1 %v3234_v11  ;;  %v296_v62 = vmul.f32 0.25, %v288_v58  ;;  %335 = vst [vmem:[#allocation2 + $0x28] sm:$0xf] %v327_v61  ;;  %v369_v10 = vshll.u32 %v3631_v59, 16  ;;  %v220_v58 = vld [vmem:[%s3611_s9 + $0x78] sm:$0xff]   ;;  %s3370_s23 = sshll.u32 %s3445_s29, 4  ;;  %s3371_s23 = int_to_ptr.vmem [resolvable:$false] %s3370_s23 }
  0x6a   : > { %2970 = vmatprep.subr.bf16.mxu0 %v3235_v14  ;;  %vm780_vm3 = vsmask.f32 7440  ;;  %p3368_p6 = pnand %p3367_p4, %p3559_p12  ;;  %s3372_s30 = scalar_lea.vmem %s3371_s23, 2048 }
  0x6b   : > { %v328_v2 = vpack.c.bf16 %v296_v62, %v296_v62  ;;  %vm3759_vm5 = vmor %vm779_vm2, %vm780_vm3  ;;  %p3373_p10 = scmp.lt.s32.totalorder %s4004_s26, %s3371_s23  ;;  %p3374_p13 = scmp.lt.s32.totalorder %s3372_s30, %s3366_s28 }
  0x6c   : > { %2875 = vmatpush3.bf16.msra.mxu1 %v3234_v11  ;;  %v231_v11 = vunpack.c.l.bf16 %v215_v3  ;;  %v266_v3 = vunpack.c.h.bf16 %v218_v30  ;;  %p3369_p8 = pneg %p3368_p6 }
  0x6d   : > { %2971 = vmatpush3.bf16.msra.mxu0 %v3235_v14  ;;  %2876 = vmatprep.subr.bf16.mxu1 %v3236_v21  ;;  %v3642_v9 = vld [vmem:[#allocation2 + $0x10] sm:$0xf]  ;;  %336 = vst [vmem:[#allocation2 + $0x34] sm:$0xf] %v328_v2  ;;  %v232_v14 = vunpack.c.l.bf16 %v216_v8  ;;  %v235_v8 = vunpack.c.l.bf16 %v219_v52  ;;  %p3375_p3 = por %p3374_p13, %p3373_p10 }
  0x6e   : > { %2972 = vmatprep.subr.bf16.mxu0 %v3237_v33  ;;  %v2624_v12 = vcombine.low %v3631_v59, %v3642_v9  ;;  %v3647_v13 = vld [vmem:[#allocation2 + $0x10] sm:$0xf]  ;;  %v379_v17 = vshrl.u32 %v3642_v9, 16  ;;  %v382_v25 = vshll.u32 %v3642_v9, 16  ;;  %v279_v34 = vadd.f32 %v263_v15, %v231_v11 }
  0x6f   : > { %v1070_v18 = vshrl.u32 %v3647_v13, 16  ;;  %v3653_v20 = vld [vmem:[#allocation2 + $0x1c] sm:$0xf]  ;;  %v1073_v31 = vshll.u32 %v3647_v13, 16  ;;  %v280_v35 = vadd.f32 %v264_v16, %v232_v14  ;;  %v1484_v11 = vld [vmem:[#allocation2 + $0x10] sm:$0xf]  ;;  %v282_v15 = vadd.f32 %v266_v3, %v234_v46  ;;  %p3376_p7 = pnand %p3375_p3, %p3369_p8 }
  0x70   : > { %2877 = vmatpush3.bf16.msra.mxu1 %v3236_v21  ;;  %2880 = vmatprep.mubr.bf16.mxu1 %v2624_v12  ;;  %v3655_v21 = vld [vmem:[#allocation2 + $0x1c] sm:$0xf]  ;;  %v1083_v26 = vshrl.u32 %v3653_v20, 16  ;;  %v2680_v27 = vcombine.low %v3647_v13, %v3653_v20  ;;  %v3662_v28 = vld [vmem:[#allocation2 + $0x28] sm:$0xf]  ;;  %v3668_v36 = vrot.slane %v379_v17, 7  ;;  %v236_v16 = vunpack.c.l.bf16 %v220_v58 }
  0x71   : > { %2973 = vmatpush3.bf16.msra.mxu0 %v3237_v33  ;;  %2878 = vmatprep.subr.bf16.mxu1 %v3238_v45  ;;  %v392_v29 = vshrl.u32 %v3655_v21, 16  ;;  %v405_v32 = vshrl.u32 %v3662_v28, 16  ;;  %v3246_v33 = vld [vmem:[#allocation6 + $0x8] sm:$0xff]   ;;  %v3670_v37 = vrot.slane %v1070_v18, 7  ;;  %v2625_v38 = vcombine.low %v3655_v21, %v3662_v28  ;;  %v3674_v39 = vld [vmem:[#allocation2 + $0x28] sm:$0xf] }
  0x72   : > { %2974 = vmatprep.subr.bf16.mxu0 %v3239_v49  ;;  %2976 = vmatprep.mubr.bf16.mxu0 %v2680_v27  ;;  %v1086_v41 = vshll.u32 %v3653_v20, 16  ;;  %v1096_v43 = vshrl.u32 %v3674_v39, 16  ;;  %v3680_v47 = vrot.slane %v1083_v26, 7  ;;  %v408_v50 = vshll.u32 %v3662_v28, 16  ;;  %v3249_v12 = vld [vmem:[#allocation6 + $0x150] sm:$0xff]   ;;  %v3250_v18 = vld [vmem:[#allocation6 + $0x18] sm:$0xff]  }
  0x73   : > { %v3682_v48 = vrot.slane %v392_v29, 7  ;;  %v3687_v53 = vrot.slane %v405_v32, 7  ;;  %v1099_v54 = vshll.u32 %v3674_v39, 16  ;;  %v290_v0 = vadd.f32 %v280_v35, %v279_v34  ;;  %v1486_v26 = vld [vmem:[#allocation2 + $0x1c] sm:$0xf]  ;;  %v3251_v27 = vld [vmem:[#allocation6 + $0x158] sm:$0xff]  }
  0x74   : > { %2879 = vmatpush3.bf16.msra.mxu1 %v3238_v45  ;;  %v3677_v42 = vld [vmem:[#allocation2 + $0x34] sm:$0xf]  ;;  %v289_v45 = vadd.f32 %v278_v23, %v277_v22  ;;  %v3698_v1 = vrot.slane %v1096_v43, 7  ;;  %v267_v17 = vunpack.c.h.bf16 %v219_v52  ;;  %v268_v23 = vunpack.c.h.bf16 %v220_v58  ;;  %v1487_v3 = vld [vmem:[#allocation2 + $0x20] sm:$0x1] }
  0x75   : > { %2975 = vmatpush3.bf16.msra.mxu0 %v3239_v49  ;;  %2888 = vmatprep.subr.bf16.mxu1 %v3629_v56  ;;  %v395_v49 = vshll.u32 %v3655_v21, 16  ;;  %v2681_v55 = vcombine.low %v3674_v39, %v3677_v42  ;;  %v1109_v61 = vshrl.u32 %v3677_v42, 16  ;;  %v1112_v62 = vshll.u32 %v3677_v42, 16  ;;  %v3696_v63 = vld [vmem:[#allocation2 + $0x34] sm:$0xf] }
  0x76   : > { %2984 = vmatprep.subr.bf16.mxu0 %v3633_v60  ;;  %v297_v57 = vmul.f32 0.25, %v289_v45  ;;  %v418_v6 = vshrl.u32 %v3696_v63, 16  ;;  %v298_v7 = vmul.f32 0.25, %v290_v0  ;;  %v283_v30 = vadd.f32 %v267_v17, %v235_v8  ;;  %v1485_v45 = vld [vmem:[#allocation2 + $0x14] sm:$0x1]  ;;  %v3254_v8 = vld [vmem:[#allocation6 + $0x28] sm:$0xff]  }
  0x77   : > { %2881 = vmatmul.mubr.bf16.vlgmr.msra.gmra.mrb[0].mxu1 %v2625_v38  ;;  %v1501_v32 = vshrl.u32 %v1484_v11, 16  ;;  %v3705_v34 = vor.u32 %v369_v10, %v3651_v19  ;;  %v3707_v35 = vrot.slane %v1109_v61, 7  ;;  %v3252_v38 = vld [vmem:[#allocation6 + $0x20] sm:$0xff]   ;;  %v284_v43 = vadd.f32 %v268_v23, %v236_v16  ;;  %v347_v16 = vld [vmem:[#allocation2 + $0x24] sm:$0x8] }
  0x78   : > { %2889 = vmatpush3.bf16.msra.mxu1 %v3629_v56  ;;  %2977 = vmatmul.mubr.bf16.vlgmr.msra.gmra.mrb[0].mxu0 %v2681_v55  ;;  %v329_v2 = vpack.c.bf16 %v297_v57, %v297_v57  ;;  %v265_v56 = vunpack.c.h.bf16 %v217_v24  ;;  %v330_v22 = vpack.c.bf16 %v298_v7, %v298_v7  ;;  %v374_v24 = vshrl.u32 %v343_v5, 16  ;;  %v3253_v5 = vld [vmem:[#allocation6 + $0x160] sm:$0xff]   ;;  %v3255_v17 = vld [vmem:[#allocation6 + $0x168] sm:$0xff]  }
  0x79   : > { %2890 = vmatprep.subr.bf16.mxu1 %v3246_v33  ;;  %2985 = vmatpush3.bf16.msra.mxu0 %v3633_v60  ;;  %v361_v60 = vshrl.u32 %v341_v4, 16  ;;  %v1503_v52 = vrot.slane %v1501_v32, 4  ;;  %v1515_v57 = vshrl.u32 %v1486_v26, 16  ;;  %v384_v59 = vor.u32 %v382_v25, %v3668_v36  ;;  %v3257_v32 = vld [vmem:[#allocation6 + $0x30] sm:$0xff]  }
  0x7a   : > { %2986 = vmatprep.subr.bf16.mxu0 %v3247_v44  ;;  %337 = vst [vmem:[#allocation2 + $0x40] sm:$0xf] %v329_v2  ;;  %v281_v14 = vadd.f32 %v265_v56, %v233_v40  ;;  %v421_v40 = vshll.u32 %v3696_v63, 16  ;;  %338 = vst [vmem:[#allocation2 + $0x4c] sm:$0xf] %v330_v22  ;;  %v292_v10 = vadd.f32 %v284_v43, %v283_v30  ;;  %v3713_v58 = vrot.slane %v418_v6, 7 }
  0x7b   : > { %v2616_v19 = vrot.slane %v361_v60, 11  ;;  %v1510_v2 = vshll.u32 %v1485_v45, 16  ;;  %v3724_v9 = vor.u32 %v395_v49, %v3682_v48  ;;  %v1518_v4 = vshll.u32 %v1486_v26, 16  ;;  %v345_v49 = vld [vmem:[#allocation2 + $0x18] sm:$0x8] }
  0x7c   : > { %2891 = vmatpush3.bf16.msra.mxu1 %v3246_v33  ;;  %v291_v29 = vadd.f32 %v282_v15, %v281_v14  ;;  %v1504_v33 = vshll.u32 %v1484_v11, 16  ;;  %v300_v56 = vmul.f32 0.25, %v292_v10  ;;  %v1517_v48 = vrot.slane %v1515_v57, 4  ;;  %v3743_v26 = vld [vmem:[#allocation2 + $0x28] sm:$0xf] }
  0x7d   : > { %2892 = vmatprep.subr.bf16.mxu1 %v3248_v51  ;;  %2987 = vmatpush3.bf16.msra.mxu0 %v3247_v44  ;;  %v2617_v44 = vrot.slane %v374_v24, 11  ;;  %v1520_v15 = vrot.slane %v1518_v4, 5  ;;  %v1512_v24 = vrot.slane %v1510_v2, 5  ;;  %v400_v57 = vshrl.u32 %v347_v16, 16  ;;  %v3262_v2 = vld [vmem:[#allocation6 + $0x38] sm:$0xff]  }
  0x7e   : > { %2988 = vmatprep.subr.bf16.mxu0 %v3249_v12  ;;  %v299_v46 = vmul.f32 0.25, %v291_v29  ;;  %v1506_v55 = vrot.slane %v1504_v33, 5  ;;  %v332_v11 = vpack.c.bf16 %v300_v56, %v300_v56  ;;  %v3748_v29 = vor.u32 %v408_v50, %v3687_v53  ;;  %v1489_v4 = vld [vmem:[#allocation2 + $0x2c] sm:$0x1] }
  0x7f   : > { %v385_v14 = vsel %vm3717_vm4, %v2617_v44, %v384_v59  ;;  %v1521_v53 = vor.u32 %v1520_v15, %v1517_v48  ;;  %v3259_v59 = vld [vmem:[#allocation6 + $0x170] sm:$0xff]   ;;  %v3889_v20 = vor.u32 %v1099_v54, %v3698_v1 }
  0x80   : > { %2893 = vmatpush3.bf16.msra.mxu1 %v3248_v51  ;;  %v331_v61 = vpack.c.bf16 %v299_v46, %v299_v46  ;;  %v1507_v51 = vor.u32 %v1506_v55, %v1503_v52  ;;  %340 = vst [vmem:[#allocation2 + $0x64] sm:$0xf] %v332_v11  ;;  %v387_v55 = vshrl.u32 %v345_v49, 16  ;;  %v1532_v11 = vshll.u32 %v3743_v26, 16 }
  0x81   : > { %2894 = vmatprep.subr.bf16.mxu1 %v3250_v18  ;;  %2989 = vmatpush3.bf16.msra.mxu0 %v3249_v12  ;;  %v3726_v25 = vld [vmem:[#allocation2 + $0x40] sm:$0xf]  ;;  %v372_v12 = vsel %vm3717_vm4, %v2616_v19, %v3705_v34  ;;  %v3740_v22 = vld [vmem:[#allocation2 + $0x4c] sm:$0xf] }
  0x82   : > { %v3728_v36 = vld [vmem:[#allocation2 + $0x40] sm:$0xf]  ;;  %2990 = vmatprep.subr.bf16.mxu0 %v3251_v27  ;;  %v431_v6 = vshrl.u32 %v3726_v25, 16  ;;  %v2626_v7 = vcombine.low %v3696_v63, %v3726_v25  ;;  %339 = vst [vmem:[#allocation2 + $0x58] sm:$0xf] %v331_v61  ;;  %v1508_v60 = vrot.slane %v1507_v51, 4  ;;  %v2636_v50 = vcombine.low %v372_v12, %v385_v14 }
  0x83   : > { %v1122_v21 = vshrl.u32 %v3728_v36, 16  ;;  %v1125_v23 = vshll.u32 %v3728_v36, 16  ;;  %v1135_v33 = vshrl.u32 %v3740_v22, 16  ;;  %v2682_v34 = vcombine.low %v3728_v36, %v3740_v22  ;;  %v3755_v43 = vld [vmem:[#allocation2 + $0x4c] sm:$0xf] }
  0x84   : > { %2895 = vmatpush3.bf16.msra.mxu1 %v3250_v18  ;;  %v434_v18 = vshll.u32 %v3726_v25, 16  ;;  %2884 = vmatprep.mubr.bf16.mxu1 %v2626_v7  ;;  %v3750_v30 = vrot.slane %v431_v6, 7  ;;  %v1138_v46 = vshll.u32 %v3740_v22, 16  ;;  %v444_v52 = vshrl.u32 %v3755_v43, 16  ;;  %v1490_v6 = vld [vmem:[#allocation2 + $0x34] sm:$0xf] }
  0x85   : > { %2896 = vmatprep.subr.bf16.mxu1 %v3252_v38  ;;  %2991 = vmatpush3.bf16.msra.mxu0 %v3251_v27  ;;  %v3763_v28 = vrot.slane %v1122_v21, 7  ;;  %v1524_v27 = vshll.u32 %v1487_v3, 16  ;;  %v447_v10 = vshll.u32 %v3755_v43, 16  ;;  %v1513_v19 = vsel %vm3759_vm5, %v1508_v60, %v1512_v24  ;;  %v3267_v25 = vld [vmem:[#allocation6 + $0x188] sm:$0xff]   ;;  %v2211_v0 = vld [vmem:[#allocation2 + $0x4c] sm:$0xf] }
  0x86   : > { %2992 = vmatprep.subr.bf16.mxu0 %v3253_v5  ;;  %2980 = vmatprep.mubr.bf16.mxu0 %v2682_v34  ;;  %v3770_v61 = vrot.slane %v1135_v33, 7  ;;  %v2618_v56 = vrot.slane %v387_v55, 11  ;;  %v2619_v3 = vrot.slane %v400_v57, 11  ;;  %v1529_v7 = vshrl.u32 %v3743_v26, 16 }
  0x87   : > { %v1526_v44 = vrot.slane %v1524_v27, 5  ;;  %v446_v12 = vrot.slane %v444_v52, 7  ;;  %v3264_v27 = vld [vmem:[#allocation6 + $0x80] sm:$0xff]   ;;  %v1534_v57 = vrot.slane %v1532_v11, 5  ;;  %v3266_v11 = vld [vmem:[#allocation6 + $0x88] sm:$0xff]  }
  0x88   : > { %2897 = vmatpush3.bf16.msra.mxu1 %v3252_v38  ;;  %v1522_v38 = vrot.slane %v1521_v53, 4  ;;  %v398_v33 = vsel %vm3717_vm4, %v2618_v56, %v3724_v9  ;;  %v3263_v53 = vld [vmem:[#allocation6 + $0x178] sm:$0xff]   ;;  %v411_v52 = vsel %vm3717_vm4, %v2619_v3, %v3748_v29  ;;  %v1531_v55 = vrot.slane %v1529_v7, 4 }
  0x89   : > { %2898 = vmatprep.subr.bf16.mxu1 %v3254_v8  ;;  %2993 = vmatpush3.bf16.msra.mxu0 %v3253_v5  ;;  %v3772_v51 = vld [vmem:[#allocation2 + $0x58] sm:$0xf]  ;;  %v1546_v9 = vshll.u32 %v1490_v6, 16  ;;  %v3930_v36 = vor.u32 %v1138_v46, %v3770_v61 }
  0x8a   : > { %2994 = vmatprep.subr.bf16.mxu0 %v3255_v17  ;;  %v457_v21 = vshrl.u32 %v3772_v51, 16  ;;  %v2627_v48 = vcombine.low %v3755_v43, %v3772_v51  ;;  %v3778_v49 = vld [vmem:[#allocation2 + $0x58] sm:$0xf]  ;;  %v1527_v15 = vsel %vm3759_vm5, %v1522_v38, %v1526_v44  ;;  %v460_v16 = vshll.u32 %v3772_v51, 16 }
  0x8b   : > { %v1491_v5 = vld [vmem:[#allocation2 + $0x38] sm:$0x1]  ;;  %v1148_v14 = vshrl.u32 %v3778_v49, 16  ;;  %v1151_v60 = vshll.u32 %v3778_v49, 16  ;;  %v2692_v24 = vcombine.low %v1513_v19, %v1527_v15  ;;  %v1538_v19 = vshll.u32 %v1489_v4, 16 }
  0x8c   : > { %2899 = vmatpush3.bf16.msra.mxu1 %v3254_v8  ;;  %v3785_v8 = vld [vmem:[#allocation2 + $0x64] sm:$0xf]  ;;  %v3791_v26 = vrot.slane %v457_v21, 7  ;;  %v1543_v38 = vshrl.u32 %v1490_v6, 16  ;;  %v3802_v21 = vld [vmem:[#allocation6 + $0x180] sm:$0xff]   ;;  %v1535_v29 = vor.u32 %v1534_v57, %v1531_v55  ;;  %v2637_v4 = vcombine.low %v398_v33, %v411_v52 }
  0x8d   : > { %2900 = vmatprep.subr.bf16.mxu1 %v3257_v32  ;;  %2885 = vmatmul.mubr.bf16.gmra.mrb[4].mxu1 %v2627_v48  ;;  %v2683_v34 = vcombine.low %v3778_v49, %v3785_v8  ;;  %v1161_v44 = vshrl.u32 %v3785_v8, 16  ;;  %v1540_v3 = vrot.slane %v1538_v19, 5  ;;  %v349_v48 = vld [vmem:[#allocation2 + $0x30] sm:$0x8]  ;;  %v436_v55 = vor.u32 %v434_v18, %v3750_v30  ;;  %v1492_v57 = vld [vmem:[#allocation2 + $0x40] sm:$0xf] }
  0x8e   : > { %2995 = vmatpush3.bf16.msra.mxu0 %v3255_v17  ;;  %2904 = vmatprep.mubr.bf16.mxu1 %v2636_v50  ;;  %v3798_v17 = vrot.slane %v1148_v14, 7  ;;  %v1552_v50 = vshll.u32 %v1491_v5, 16  ;;  %v1545_v7 = vrot.slane %v1543_v38, 4  ;;  %v351_v14 = vld [vmem:[#allocation2 + $0x3c] sm:$0x8]  ;;  %v413_v15 = vshrl.u32 %v349_v48, 16 }
  0x8f   : > { %2996 = vmatprep.subr.bf16.mxu0 %v3259_v59  ;;  %2981 = vmatmul.mubr.bf16.gmra.mrb[4].mxu0 %v2683_v34  ;;  %v423_v34 = vor.u32 %v421_v40, %v3713_v58  ;;  %v1536_v5 = vrot.slane %v1535_v29, 4  ;;  %v426_v56 = vshrl.u32 %v351_v14, 16  ;;  %v1493_v33 = vld [vmem:[#allocation2 + $0x44] sm:$0x1]  ;;  %v1494_v52 = vld [vmem:[#allocation2 + $0x4c] sm:$0xf]  ;;  %v3812_v38 = vor.u32 %v447_v10, %v446_v12 }
  0x90   : > { %2901 = vmatpush3.bf16.msra.mxu1 %v3257_v32  ;;  %3000 = vmatprep.mubr.bf16.mxu0 %v2692_v24  ;;  %v1548_v32 = vrot.slane %v1546_v9, 5  ;;  %v1554_v6 = vrot.slane %v1552_v50, 5  ;;  %v1557_v19 = vshrl.u32 %v1492_v57, 16  ;;  %v1560_v9 = vshll.u32 %v1492_v57, 16  ;;  %v3268_v18 = vld [vmem:[#allocation6 + $0x90] sm:$0xff]  }
  0x91   : > { %2902 = vmatprep.subr.bf16.mxu1 %v3262_v2  ;;  %v1541_v63 = vsel %vm3759_vm5, %v1536_v5, %v1540_v3  ;;  %v2621_v58 = vrot.slane %v426_v56, 11  ;;  %v1566_v29 = vshll.u32 %v1493_v33, 16  ;;  %v353_v56 = vld [vmem:[#allocation2 + $0x48] sm:$0x8]  ;;  %v355_v14 = vld [vmem:[#allocation2 + $0x54] sm:$0x8]  ;;  %v1153_v22 = vor.u32 %v1151_v60, %v3798_v17 }
  0x92   : > { %2997 = vmatpush3.bf16.msra.mxu0 %v3259_v59  ;;  %v1549_v24 = vor.u32 %v1548_v32, %v1545_v7  ;;  %v2620_v59 = vrot.slane %v413_v15, 11  ;;  %v1559_v50 = vrot.slane %v1557_v19, 4  ;;  %v1571_v7 = vshrl.u32 %v1494_v52, 16  ;;  %v1496_v15 = vld [vmem:[#allocation2 + $0x58] sm:$0xf]  ;;  %v3294_v60 = vld [vmem:[#allocation6 + $0xf8] sm:$0xff]  }
  0x93   : > { %2998 = vmatprep.subr.bf16.mxu0 %v3263_v53  ;;  %v437_v10 = vsel %vm3717_vm4, %v2621_v58, %v436_v55  ;;  %v1562_v12 = vrot.slane %v1560_v9, 5  ;;  %v1568_v48 = vrot.slane %v1566_v29, 5  ;;  %v1497_v57 = vld [vmem:[#allocation2 + $0x5c] sm:$0x1]  ;;  %v462_v55 = vor.u32 %v460_v16, %v3791_v26  ;;  %v1498_v33 = vld [vmem:[#allocation2 + $0x64] sm:$0xf] }
  0x94   : > { %2903 = vmatpush3.bf16.msra.mxu1 %v3262_v2  ;;  %v1550_v40 = vrot.slane %v1549_v24, 4  ;;  %v1495_v2 = vld [vmem:[#allocation2 + $0x50] sm:$0x1]  ;;  %v424_v30 = vsel %vm3717_vm4, %v2620_v59, %v423_v34  ;;  %v452_v59 = vshrl.u32 %v355_v14, 16  ;;  %v1585_v19 = vshrl.u32 %v1496_v15, 16 }
  0x95   : > { %2912 = vmatprep.subr.bf16.mxu1 %v3264_v27  ;;  %v2638_v32 = vcombine.low %v424_v30, %v437_v10  ;;  %v1563_v34 = vor.u32 %v1562_v12, %v1559_v50  ;;  %v1580_v24 = vshll.u32 %v1495_v2, 16  ;;  %v1588_v29 = vshll.u32 %v1496_v15, 16  ;;  %v764_v15 = vld [vmem:[#allocation2 + $0x8] sm:$0x1] }
  0x96   : > { %2999 = vmatpush3.bf16.msra.mxu0 %v3263_v53  ;;  %v1555_v43 = vsel %vm3759_vm5, %v1550_v40, %v1554_v6  ;;  %v1574_v53 = vshll.u32 %v1494_v52, 16  ;;  %v3269_v6 = vld [vmem:[#allocation6 + $0x190] sm:$0xff]   ;;  %v2623_v30 = vrot.slane %v452_v59, 11  ;;  %v1587_v50 = vrot.slane %v1585_v19, 4  ;;  %v3274_v19 = vld [vmem:[#allocation6 + $0xa8] sm:$0xff]  }
  0x97   : > { %2905 = vmatmul.mubr.bf16.vlgmr.msra.gmra.mrb[0].mxu1 %v2637_v4  ;;  %3008 = vmatprep.subr.bf16.mxu0 %v3802_v21  ;;  %v2693_v3 = vcombine.low %v1541_v63, %v1555_v43  ;;  %v1573_v4 = vrot.slane %v1571_v7, 4  ;;  %v1499_v52 = vld [vmem:[#allocation2 + $0x68] sm:$0x1]  ;;  %v3270_v63 = vld [vmem:[#allocation6 + $0x98] sm:$0xff]   ;;  %v1564_v40 = vrot.slane %v1563_v34, 4  ;;  %v1582_v2 = vrot.slane %v1580_v24, 5 }
  0x98   : > { %2913 = vmatpush3.bf16.msra.mxu1 %v3264_v27  ;;  %v1576_v5 = vrot.slane %v1574_v53, 5  ;;  %v439_v27 = vshrl.u32 %v353_v56, 16  ;;  %2908 = vmatprep.mubr.bf16.mxu1 %v2638_v32  ;;  %v1594_v7 = vshll.u32 %v1497_v57, 16  ;;  %v3272_v43 = vld [vmem:[#allocation6 + $0xa0] sm:$0xff]   ;;  %v463_v10 = vsel %vm3717_vm4, %v2623_v30, %v462_v55 }
  0x99   : > { %2914 = vmatprep.subr.bf16.mxu1 %v3266_v11  ;;  %3001 = vmatmul.mubr.bf16.vlgmr.msra.gmra.mrb[0].mxu0 %v2693_v3  ;;  %v1569_v51 = vsel %vm3759_vm5, %v1564_v40, %v1568_v48  ;;  %v1590_v12 = vrot.slane %v1588_v29, 5  ;;  %v1602_v56 = vshll.u32 %v1498_v33, 16  ;;  %v763_v3 = vld [vmem:[#allocation2 + $0x4] sm:$0xf]  ;;  %v1608_v14 = vshll.u32 %v1499_v52, 16 }
  0x9a   : > { %3009 = vmatpush3.bf16.msra.mxu0 %v3802_v21  ;;  %v1577_v58 = vor.u32 %v1576_v5, %v1573_v4  ;;  %v2622_v9 = vrot.slane %v439_v27, 11  ;;  %v1599_v21 = vshrl.u32 %v1498_v33, 16  ;;  %v1596_v53 = vrot.slane %v1594_v7, 5  ;;  %v766_v27 = vld [vmem:[#allocation2 + $0x14] sm:$0x1]  ;;  %v3273_v33 = vld [vmem:[#allocation6 + $0x1a0] sm:$0xff]  }
  0x9b   : > { %3010 = vmatprep.subr.bf16.mxu0 %v3267_v25  ;;  %v1591_v5 = vor.u32 %v1590_v12, %v1587_v50  ;;  %v1604_v24 = vrot.slane %v1602_v56, 5  ;;  %v783_v57 = vshrl.u32 %v763_v3, 16  ;;  %v1610_v59 = vrot.slane %v1608_v14, 5  ;;  %v3840_v12 = vld [vmem:[#allocation2 + $0x28] sm:$0xf] }
  0x9c   : > { %2915 = vmatpush3.bf16.msra.mxu1 %v3266_v11  ;;  %v1578_v16 = vrot.slane %v1577_v58, 4  ;;  %v450_v26 = vsel %vm3717_vm4, %v2622_v9, %v3812_v38  ;;  %v3271_v11 = vld [vmem:[#allocation6 + $0x198] sm:$0xff]   ;;  %v1601_v4 = vrot.slane %v1599_v21, 4  ;;  %v786_v55 = vshll.u32 %v763_v3, 16  ;;  %v1767_v9 = vld [vmem:[#allocation2 + $0x18] sm:$0x8] }
  0x9d   : > { %2916 = vmatprep.subr.bf16.mxu1 %v3268_v18  ;;  %v2639_v48 = vcombine.low %v450_v26, %v463_v10  ;;  %v765_v38 = vld [vmem:[#allocation2 + $0x10] sm:$0xf]  ;;  %v1592_v40 = vrot.slane %v1591_v5, 4  ;;  %v785_v52 = vrot.slane %v783_v57, 4  ;;  %v806_v7 = vshll.u32 %v766_v27, 16 }
  0x9e   : > { %3011 = vmatpush3.bf16.msra.mxu0 %v3267_v25  ;;  %v1583_v32 = vsel %vm3759_vm5, %v1578_v16, %v1582_v2  ;;  %v792_v25 = vshll.u32 %v764_v15, 16  ;;  %v1605_v58 = vor.u32 %v1604_v24, %v1601_v4  ;;  %v800_v2 = vshll.u32 %v765_v38, 16  ;;  %v1769_v10 = vld [vmem:[#allocation2 + $0x24] sm:$0x8]  ;;  %v768_v57 = vld [vmem:[#allocation2 + $0x20] sm:$0x1] }
  0x9f   : > { %3012 = vmatprep.subr.bf16.mxu0 %v3269_v6  ;;  %v2694_v34 = vcombine.low %v1569_v51, %v1583_v32  ;;  %2909 = vmatmul.mubr.bf16.gmra.mrb[4].mxu1 %v2639_v48  ;;  %v788_v30 = vrot.slane %v786_v55, 5  ;;  %v3836_v51 = vld [vmem:[#allocation2 + $0x1c] sm:$0xf]  ;;  %v1597_v16 = vsel %vm3759_vm5, %v1592_v40, %v1596_v53  ;;  %v808_v3 = vrot.slane %v806_v7, 5  ;;  %v3275_v32 = vld [vmem:[#allocation6 + $0x1a8] sm:$0xff]   ;;  %v3276_v53 = vld [vmem:[#allocation6 + $0xb0] sm:$0xff]  }
  0xa0   : > { %2917 = vmatpush3.bf16.msra.mxu1 %v3268_v18  ;;  %v797_v18 = vshrl.u32 %v765_v38, 16  ;;  %v794_v50 = vrot.slane %v792_v25, 5  ;;  %v1606_v26 = vrot.slane %v1605_v58, 4  ;;  %v802_v21 = vrot.slane %v800_v2, 5  ;;  %v767_v38 = vld [vmem:[#allocation2 + $0x1c] sm:$0xf] }
  0xa1   : > { %2918 = vmatprep.subr.bf16.mxu1 %v3270_v63  ;;  %3004 = vmatprep.mubr.bf16.mxu0 %v2694_v34  ;;  %v789_v56 = vor.u32 %v788_v30, %v785_v52  ;;  %v1792_v14 = vshll.u32 %v3836_v51, 16  ;;  %v1797_v15 = vshrl.u32 %v1769_v10, 16  ;;  %v769_v40 = vld [vmem:[#allocation2 + $0x28] sm:$0xf]  ;;  %v770_v58 = vld [vmem:[#allocation2 + $0x2c] sm:$0x1] }
  0xa2   : > { %3013 = vmatpush3.bf16.msra.mxu0 %v3269_v6  ;;  %v799_v29 = vrot.slane %v797_v18, 4  ;;  %v1784_v6 = vshrl.u32 %v1767_v9, 16  ;;  %v1611_v48 = vsel %vm3759_vm5, %v1606_v26, %v1610_v59  ;;  %v1802_v18 = vshrl.u32 %v3840_v12, 16  ;;  %v1771_v9 = vld [vmem:[#allocation2 + $0x30] sm:$0x8]  ;;  %v3277_v30 = vld [vmem:[#allocation6 + $0x1b0] sm:$0xff]  }
  0xa3   : > { %3014 = vmatprep.subr.bf16.mxu0 %v3271_v11  ;;  %v2695_v34 = vcombine.low %v1597_v16, %v1611_v48  ;;  %v790_v5 = vrot.slane %v789_v56, 4  ;;  %v2705_v25 = vrot.slane %v1797_v15, 11  ;;  %v1805_v59 = vshll.u32 %v3840_v12, 16  ;;  %v3856_v48 = vld [vmem:[#allocation2 + $0x40] sm:$0xf] }
  0xa4   : > { %2919 = vmatpush3.bf16.msra.mxu1 %v3270_v63  ;;  %v1789_v63 = vshrl.u32 %v3836_v51, 16  ;;  %v803_v4 = vor.u32 %v802_v21, %v799_v29  ;;  %v2704_v24 = vrot.slane %v1784_v6, 11  ;;  %v811_v52 = vshrl.u32 %v767_v38, 16  ;;  %v3852_v21 = vld [vmem:[#allocation2 + $0x34] sm:$0xf] }
  0xa5   : > { %2920 = vmatprep.subr.bf16.mxu1 %v3272_v43  ;;  %3005 = vmatmul.mubr.bf16.gmra.mrb[4].mxu0 %v2695_v34  ;;  %v814_v2 = vshll.u32 %v767_v38, 16  ;;  %v1804_v7 = vrot.slane %v1802_v18, 7  ;;  %v820_v16 = vshll.u32 %v768_v57, 16  ;;  %v825_v26 = vshrl.u32 %v769_v40, 16 }
  0xa6   : > { %3015 = vmatpush3.bf16.msra.mxu0 %v3271_v11  ;;  %v1791_v27 = vrot.slane %v1789_v63, 7  ;;  %v804_v55 = vrot.slane %v803_v4, 4  ;;  %v795_v11 = vsel %vm3759_vm5, %v790_v5, %v794_v50  ;;  %v813_v56 = vrot.slane %v811_v52, 4  ;;  %v1773_v63 = vld [vmem:[#allocation2 + $0x3c] sm:$0x8]  ;;  %v3278_v4 = vld [vmem:[#allocation6 + $0xb8] sm:$0xff]  }
  0xa7   : > { %3016 = vmatprep.subr.bf16.mxu0 %v3273_v33  ;;  %v816_v6 = vrot.slane %v814_v2, 5  ;;  %v827_v15 = vrot.slane %v825_v26, 4  ;;  %v828_v38 = vshll.u32 %v769_v40, 16  ;;  %v1815_v5 = vshrl.u32 %v3852_v21, 16 }
  0xa8   : > { %2921 = vmatpush3.bf16.msra.mxu1 %v3272_v43  ;;  %v1794_v43 = vor.u32 %v1792_v14, %v1791_v27  ;;  %v809_v29 = vsel %vm3759_vm5, %v804_v55, %v808_v3  ;;  %v1807_v3 = vor.u32 %v1805_v59, %v1804_v7  ;;  %v822_v14 = vrot.slane %v820_v16, 5  ;;  %v3279_v59 = vld [vmem:[#allocation6 + $0x1b8] sm:$0xff]  }
  0xa9   : > { %2922 = vmatprep.subr.bf16.mxu1 %v3274_v19  ;;  %v2648_v10 = vcombine.low %v795_v11, %v809_v29  ;;  %v817_v34 = vor.u32 %v816_v6, %v813_v56  ;;  %v830_v27 = vrot.slane %v828_v38, 5  ;;  %v1818_v57 = vshll.u32 %v3852_v21, 16 }
  0xaa   : > { %3017 = vmatpush3.bf16.msra.mxu0 %v3273_v33  ;;  %v1795_v50 = vsel %vm3717_vm4, %v2704_v24, %v1794_v43  ;;  %v834_v33 = vshll.u32 %v770_v58, 16  ;;  %v1808_v24 = vsel %vm3717_vm4, %v2705_v25, %v1807_v3  ;;  %v1823_v55 = vshrl.u32 %v1773_v63, 16  ;;  %v3280_v58 = vld [vmem:[#allocation6 + $0xc0] sm:$0xff]  }
  0xab   : > { %3018 = vmatprep.subr.bf16.mxu0 %v3275_v32  ;;  %2928 = vmatprep.mubr.bf16.mxu1 %v2648_v10  ;;  %v3864_v18 = vrot.slane %v1161_v44, 7  ;;  %v2712_v40 = vcombine.low %v1795_v50, %v1808_v24  ;;  %v818_v11 = vrot.slane %v817_v34, 4  ;;  %v831_v52 = vor.u32 %v830_v27, %v827_v15  ;;  %v3281_v44 = vld [vmem:[#allocation6 + $0x1c0] sm:$0xff]   ;;  %v3282_v10 = vld [vmem:[#allocation6 + $0xc8] sm:$0xff]   ;;  %v771_v15 = vld [vmem:[#allocation2 + $0x34] sm:$0xf] }
  0xac   : > { %2923 = vmatpush3.bf16.msra.mxu1 %v3274_v19  ;;  %v1810_v19 = vshrl.u32 %v1771_v9, 16  ;;  %v836_v43 = vrot.slane %v834_v33, 5  ;;  %v1817_v25 = vrot.slane %v1815_v5, 7  ;;  %v1828_v9 = vshrl.u32 %v3856_v48, 16  ;;  %v3284_v34 = vld [vmem:[#allocation6 + $0xd0] sm:$0xff]  }
  0xad   : > { %2924 = vmatprep.subr.bf16.mxu1 %v3276_v53  ;;  %3024 = vmatprep.mubr.bf16.mxu0 %v2712_v40  ;;  %v2707_v29 = vrot.slane %v1823_v55, 11  ;;  %v1831_v7 = vshll.u32 %v3856_v48, 16  ;;  %v772_v33 = vld [vmem:[#allocation2 + $0x38] sm:$0x1]  ;;  %v774_v5 = vld [vmem:[#allocation2 + $0x44] sm:$0x1] }
  0xae   : > { %3019 = vmatpush3.bf16.msra.mxu0 %v3275_v32  ;;  %v2706_v2 = vrot.slane %v1810_v19, 11  ;;  %v823_v32 = vsel %vm3759_vm5, %v818_v11, %v822_v14  ;;  %v1820_v16 = vor.u32 %v1818_v57, %v1817_v25  ;;  %v1830_v26 = vrot.slane %v1828_v9, 7  ;;  %v3283_v14 = vld [vmem:[#allocation6 + $0x1c8] sm:$0xff]   ;;  %v3896_v55 = vld [vmem:[#allocation2 + $0x4c] sm:$0xf] }
  0xaf   : > { %3020 = vmatprep.subr.bf16.mxu0 %v3277_v30  ;;  %v773_v19 = vld [vmem:[#allocation2 + $0x40] sm:$0xf]  ;;  %v839_v24 = vshrl.u32 %v771_v15, 16  ;;  %v842_v27 = vshll.u32 %v771_v15, 16  ;;  %v848_v57 = vshll.u32 %v772_v33, 16  ;;  %v1841_v42 = vshrl.u32 %v3896_v55, 16 }
  0xb0   : > { %2925 = vmatpush3.bf16.msra.mxu1 %v3276_v53  ;;  %v832_v53 = vrot.slane %v831_v52, 4  ;;  %v1821_v56 = vsel %vm3717_vm4, %v2706_v2, %v1820_v16  ;;  %v1833_v6 = vor.u32 %v1831_v7, %v1830_v26  ;;  %v853_v13 = vshrl.u32 %v773_v19, 16  ;;  %v3898_v52 = vld [vmem:[#allocation2 + $0x58] sm:$0xf]  ;;  %v776_v7 = vld [vmem:[#allocation2 + $0x50] sm:$0x1] }
  0xb1   : > { %2926 = vmatprep.subr.bf16.mxu1 %v3278_v4  ;;  %v841_v40 = vrot.slane %v839_v24, 4  ;;  %v844_v11 = vrot.slane %v842_v27, 5  ;;  %v1844_v25 = vshll.u32 %v3896_v55, 16  ;;  %v1843_v16 = vrot.slane %v1841_v42, 7 }
  0xb2   : > { %3021 = vmatpush3.bf16.msra.mxu0 %v3277_v30  ;;  %v837_v50 = vsel %vm3759_vm5, %v832_v53, %v836_v43  ;;  %v1834_v3 = vsel %vm3717_vm4, %v2707_v29, %v1833_v6  ;;  %v3879_v30 = vor.u32 %v1073_v31, %v3670_v37  ;;  %v1775_v31 = vld [vmem:[#allocation2 + $0x48] sm:$0x8]  ;;  %v3894_v37 = vor.u32 %v1112_v62, %v3707_v35  ;;  %v775_v62 = vld [vmem:[#allocation2 + $0x4c] sm:$0xf] }
  0xb3   : > { %3022 = vmatprep.subr.bf16.mxu0 %v3279_v59  ;;  %v2649_v63 = vcombine.low %v823_v32, %v837_v50  ;;  %v2713_v38 = vcombine.low %v1821_v56, %v1834_v3  ;;  %v850_v43 = vrot.slane %v848_v57, 5  ;;  %v1836_v1 = vshrl.u32 %v1775_v31, 16  ;;  %v3285_v35 = vld [vmem:[#allocation6 + $0x1d0] sm:$0xff]   ;;  %v3286_v32 = vld [vmem:[#allocation6 + $0xd8] sm:$0xff]   ;;  %v777_v50 = vld [vmem:[#allocation2 + $0x58] sm:$0xf] }
  0xb4   : > { %2927 = vmatpush3.bf16.msra.mxu1 %v3278_v4  ;;  %v3884_v4 = vor.u32 %v1086_v41, %v3680_v47  ;;  %v856_v41 = vshll.u32 %v773_v19, 16  ;;  %v862_v47 = vshll.u32 %v774_v5, 16  ;;  %v845_v2 = vor.u32 %v844_v11, %v841_v40  ;;  %v3287_v56 = vld [vmem:[#allocation6 + $0x1d8] sm:$0xff]   ;;  %v778_v3 = vld [vmem:[#allocation2 + $0x5c] sm:$0x1] }
  0xb5   : > { %2936 = vmatprep.subr.bf16.mxu1 %v3280_v58  ;;  %v1854_v29 = vshrl.u32 %v3898_v52, 16  ;;  %v1857_v26 = vshll.u32 %v3898_v52, 16  ;;  %v867_v15 = vshrl.u32 %v775_v62, 16  ;;  %v1846_v19 = vor.u32 %v1844_v25, %v1843_v16  ;;  %v3910_v11 = vld [vmem:[#allocation2 + $0x64] sm:$0xf] }
  0xb6   : > { %3023 = vmatpush3.bf16.msra.mxu0 %v3279_v59  ;;  %v1777_v59 = vld [vmem:[#allocation2 + $0x54] sm:$0x8]  ;;  %v858_v39 = vrot.slane %v856_v41, 5  ;;  %v864_v54 = vrot.slane %v862_v47, 5  ;;  %v846_v6 = vrot.slane %v845_v2, 4  ;;  %v870_v5 = vshll.u32 %v775_v62, 16 }
  0xb7   : > { %2929 = vmatmul.mubr.bf16.vlgmr.msra.gmra.mrb[0].mxu1 %v2649_v63  ;;  %3032 = vmatprep.subr.bf16.mxu0 %v3281_v44  ;;  %v1849_v9 = vshrl.u32 %v1777_v59, 16  ;;  %v876_v24 = vshll.u32 %v776_v7, 16  ;;  %v881_v31 = vshrl.u32 %v777_v50, 16  ;;  %v1779_v41 = vld [vmem:[#allocation2 + $0x60] sm:$0x8]  ;;  %v884_v42 = vshll.u32 %v777_v50, 16 }
  0xb8   : > { %2937 = vmatpush3.bf16.msra.mxu1 %v3280_v58  ;;  %v855_v58 = vrot.slane %v853_v13, 4  ;;  %v851_v27 = vsel %vm3759_vm5, %v846_v6, %v850_v43  ;;  %v869_v13 = vrot.slane %v867_v15, 4  ;;  %v872_v59 = vrot.slane %v870_v5, 5  ;;  %v3914_v62 = vld [vmem:[#allocation2 + $0x70] sm:$0xf]  ;;  %v3290_v16 = vld [vmem:[#allocation6 + $0xe8] sm:$0xff]  }
  0xb9   : > { %2938 = vmatprep.subr.bf16.mxu1 %v3282_v10  ;;  %3025 = vmatmul.mubr.bf16.vlgmr.msra.gmra.mrb[0].mxu0 %v2713_v38  ;;  %v2709_v63 = vrot.slane %v1849_v9, 11  ;;  %v3288_v38 = vld [vmem:[#allocation6 + $0xe0] sm:$0xff]   ;;  %v878_v40 = vrot.slane %v876_v24, 5  ;;  %v890_v25 = vshll.u32 %v778_v3, 16  ;;  %v1862_v9 = vshrl.u32 %v1779_v41, 16 }
  0xba   : > { %3033 = vmatpush3.bf16.msra.mxu0 %v3281_v44  ;;  %v859_v53 = vor.u32 %v858_v39, %v855_v58  ;;  %v2708_v44 = vrot.slane %v1836_v1, 11  ;;  %v1781_v58 = vld [vmem:[#allocation2 + $0x6c] sm:$0x8]  ;;  %v883_v1 = vrot.slane %v881_v31, 4  ;;  %v1867_v7 = vshrl.u32 %v3910_v11, 16 }
  0xbb   : > { %3034 = vmatprep.subr.bf16.mxu0 %v3283_v14  ;;  %v892_v50 = vrot.slane %v890_v25, 5  ;;  %v1880_v6 = vshrl.u32 %v3914_v62, 16  ;;  %v1883_v3 = vshll.u32 %v3914_v62, 16  ;;  %v1048_v5 = vld [vmem:[#allocation2 + $0xc] sm:$0x8] }
  0xbc   : > { %2939 = vmatpush3.bf16.msra.mxu1 %v3282_v10  ;;  %v1856_v10 = vrot.slane %v1854_v29, 7  ;;  %v860_v33 = vrot.slane %v859_v53, 4  ;;  %v886_v29 = vrot.slane %v884_v42, 5  ;;  %v1870_v53 = vshll.u32 %v3910_v11, 16  ;;  %v1050_v24 = vld [vmem:[#allocation2 + $0x18] sm:$0x8] }
  0xbd   : > { %2940 = vmatprep.subr.bf16.mxu1 %v3284_v34  ;;  %v3292_v31 = vld [vmem:[#allocation6 + $0xf0] sm:$0xff]  }
  0xbe   : > { %3035 = vmatpush3.bf16.msra.mxu0 %v3283_v14  ;;  %v1859_v57 = vor.u32 %v1857_v26, %v1856_v10  ;;  %v865_v47 = vsel %vm3759_vm5, %v860_v33, %v864_v54  ;;  %v1847_v14 = vsel %vm3717_vm4, %v2708_v44, %v1846_v19  ;;  %v873_v54 = vor.u32 %v872_v59, %v869_v13 }
  0xbf   : > { %3036 = vmatprep.subr.bf16.mxu0 %v3285_v35  ;;  %v2650_v39 = vcombine.low %v851_v27, %v865_v47  ;;  %v1875_v44 = vshrl.u32 %v1781_v58, 16  ;;  %v1869_v10 = vrot.slane %v1867_v7, 7  ;;  %v1882_v19 = vrot.slane %v1880_v6, 7 }
  0xc0   : > { %2941 = vmatpush3.bf16.msra.mxu1 %v3284_v34  ;;  %v3289_v34 = vld [vmem:[#allocation6 + $0x1e0] sm:$0xff]   ;;  %v1860_v43 = vsel %vm3717_vm4, %v2709_v63, %v1859_v57  ;;  %v874_v26 = vrot.slane %v873_v54, 4  ;;  %v2710_v63 = vrot.slane %v1862_v9, 11  ;;  %v1065_v57 = vshrl.u32 %v1048_v5, 16  ;;  %v1060_v54 = vld [vmem:[#allocation2 + $0x54] sm:$0x8] }
  0xc1   : > { %2942 = vmatprep.subr.bf16.mxu1 %v3286_v32  ;;  %v2714_v2 = vcombine.low %v1847_v14, %v1860_v43  ;;  %2932 = vmatprep.mubr.bf16.mxu1 %v2650_v39  ;;  %v2711_v33 = vrot.slane %v1875_v44, 11  ;;  %v1872_v27 = vor.u32 %v1870_v53, %v1869_v10  ;;  %v1078_v13 = vshrl.u32 %v1050_v24, 16  ;;  %v1054_v14 = vld [vmem:[#allocation2 + $0x30] sm:$0x8]  ;;  %v1062_v53 = vld [vmem:[#allocation2 + $0x60] sm:$0x8] }
  0xc2   : > { %3037 = vmatpush3.bf16.msra.mxu0 %v3285_v35  ;;  %v3922_v35 = vor.u32 %v1125_v23, %v3763_v28  ;;  %v879_v15 = vsel %vm3759_vm5, %v874_v26, %v878_v40  ;;  %v3291_v23 = vld [vmem:[#allocation6 + $0x1e8] sm:$0xff]   ;;  %v1885_v41 = vor.u32 %v1883_v3, %v1882_v19  ;;  %v2724_v47 = vcombine.low %v3836_v51, %v3840_v12  ;;  %v3295_v44 = vld [vmem:[#allocation6 + $0x1f8] sm:$0xff]  }
  0xc3   : > { %3038 = vmatprep.subr.bf16.mxu0 %v3287_v56  ;;  %3028 = vmatprep.mubr.bf16.mxu0 %v2714_v2  ;;  %v1873_v61 = vsel %vm3717_vm4, %v2710_v63, %v1872_v27  ;;  %v2660_v40 = vrot.slane %v1065_v57, 11  ;;  %v2661_v58 = vrot.slane %v1078_v13, 11  ;;  %v1104_v43 = vshrl.u32 %v1054_v14, 16  ;;  %v3968_v19 = vld [vmem:[#allocation6 + $0x208] sm:$0xff]  }
  0xc4   : > { %2943 = vmatpush3.bf16.msra.mxu1 %v3286_v32  ;;  %v887_v32 = vor.u32 %v886_v29, %v883_v1  ;;  %v1886_v51 = vsel %vm3717_vm4, %v2711_v33, %v1885_v41  ;;  %v1056_v1 = vld [vmem:[#allocation2 + $0x3c] sm:$0x8]  ;;  %v1156_v26 = vshrl.u32 %v1062_v53, 16  ;;  %v2204_v24 = vld [vmem:[#allocation2 + $0x20] sm:$0x1]  ;;  %v2725_v41 = vcombine.low %v3852_v21, %v3856_v48  ;;  %v3302_v48 = vld [vmem:[#allocation6 + $0x210] sm:$0xff]  }
  0xc5   : > { %2944 = vmatprep.subr.bf16.mxu1 %v3288_v38  ;;  %v2715_v49 = vcombine.low %v1873_v61, %v1886_v51  ;;  %v1076_v17 = vsel %vm3717_vm4, %v2660_v40, %v3879_v30  ;;  %v1089_v42 = vsel %vm3717_vm4, %v2661_v58, %v3884_v4  ;;  %v1117_v2 = vshrl.u32 %v1056_v1, 16 }
  0xc6   : > { %3039 = vmatpush3.bf16.msra.mxu0 %v3287_v56  ;;  %v888_v28 = vrot.slane %v887_v32, 4  ;;  %v1052_v56 = vld [vmem:[#allocation2 + $0x24] sm:$0x8]  ;;  %v2668_v25 = vcombine.low %v1076_v17, %v1089_v42  ;;  %v2663_v29 = vrot.slane %v1104_v43, 11  ;;  %v4075_v4 = vshll.u32 %v3785_v8, 16  ;;  %v3298_v32 = vld [vmem:[#allocation6 + $0x200] sm:$0xff]  }
  0xc7   : > { %3040 = vmatprep.subr.bf16.mxu0 %v3289_v34  ;;  %v1091_v59 = vshrl.u32 %v1052_v56, 16  ;;  %3029 = vmatmul.mubr.bf16.gmra.mrb[4].mxu0 %v2715_v49  ;;  %v2664_v30 = vrot.slane %v1117_v2, 11  ;;  %v2229_v57 = vshll.u32 %v2204_v24, 16  ;;  %v2279_v43 = vshll.u32 %v2211_v0, 16 }
  0xc8   : > { %2945 = vmatpush3.bf16.msra.mxu1 %v3288_v38  ;;  %v893_v46 = vsel %vm3759_vm5, %v888_v28, %v892_v50  ;;  %v3293_v38 = vld [vmem:[#allocation6 + $0x1f0] sm:$0xff]   ;;  %v1166_v50 = vor.u32 %v4075_v4, %v3864_v18  ;;  %v1115_v6 = vsel %vm3717_vm4, %v2663_v29, %v3894_v37  ;;  %3048 = vmatprep.mubr.bf16.mxu0 %v2724_v47 }
  0xc9   : > { %2946 = vmatprep.subr.bf16.mxu1 %v3290_v16  ;;  %v2651_v39 = vcombine.low %v879_v15, %v893_v46  ;;  %v2662_v12 = vrot.slane %v1091_v59, 11  ;;  %v1128_v10 = vsel %vm3717_vm4, %v2664_v30, %v3922_v35  ;;  %v2667_v15 = vrot.slane %v1156_v26, 11  ;;  %v2203_v35 = vld [vmem:[#allocation2 + $0x1c] sm:$0xf]  ;;  %v2206_v28 = vld [vmem:[#allocation2 + $0x2c] sm:$0x1] }
  0xca   : > { %3041 = vmatpush3.bf16.msra.mxu0 %v3289_v34  ;;  %v1058_v34 = vld [vmem:[#allocation2 + $0x48] sm:$0x8]  ;;  %v2220_v27 = vshrl.u32 %v2203_v35, 16  ;;  %v2726_v47 = vcombine.low %v3896_v55, %v3898_v52  ;;  %v2213_v46 = vld [vmem:[#allocation2 + $0x58] sm:$0xf]  ;;  %v2231_v61 = vrot.slane %v2229_v57, 5  ;;  %v2727_v26 = vcombine.low %v3910_v11, %v3914_v62 }
  0xcb   : > { %3042 = vmatprep.subr.bf16.mxu0 %v3291_v23  ;;  %2933 = vmatmul.mubr.bf16.gmra.mrb[4].mxu1 %v2651_v39  ;;  %v1102_v9 = vsel %vm3717_vm4, %v2662_v12, %v3889_v20  ;;  %v1130_v7 = vshrl.u32 %v1058_v34, 16  ;;  %v1167_v33 = vsel %vm3717_vm4, %v2667_v15, %v1166_v50  ;;  %v2214_v39 = vld [vmem:[#allocation2 + $0x5c] sm:$0x1]  ;;  %v2276_v12 = vshrl.u32 %v2211_v0, 16 }
  0xcc   : > { %2947 = vmatpush3.bf16.msra.mxu1 %v3290_v16  ;;  %v1143_v16 = vshrl.u32 %v1060_v54, 16  ;;  %2952 = vmatprep.mubr.bf16.mxu1 %v2668_v25  ;;  %v2669_v63 = vcombine.low %v1102_v9, %v1115_v6  ;;  %v2222_v14 = vrot.slane %v2220_v27, 4  ;;  %v2290_v52 = vshrl.u32 %v2213_v46, 16  ;;  %v3304_v15 = vld [vmem:[#allocation6 + $0x220] sm:$0xff]   ;;  %v2216_v27 = vld [vmem:[#allocation2 + $0x68] sm:$0x1] }
  0xcd   : > { %2948 = vmatprep.subr.bf16.mxu1 %v3292_v31  ;;  %v2665_v20 = vrot.slane %v1130_v7, 11  ;;  %v2293_v1 = vshll.u32 %v2213_v46, 16  ;;  %v2299_v49 = vshll.u32 %v2214_v39, 16  ;;  %v2278_v17 = vrot.slane %v2276_v12, 4  ;;  %v3303_v7 = vld [vmem:[#allocation6 + $0x218] sm:$0xff]  }
  0xce   : > { %3043 = vmatpush3.bf16.msra.mxu0 %v3291_v23  ;;  %v2666_v3 = vrot.slane %v1143_v16, 11  ;;  %v2205_v23 = vld [vmem:[#allocation2 + $0x28] sm:$0xf]  ;;  %v2281_v42 = vrot.slane %v2279_v43, 5  ;;  %v2292_v2 = vrot.slane %v2290_v52, 4 }
  0xcf   : > { %3044 = vmatprep.subr.bf16.mxu0 %v3293_v38  ;;  %v1141_v8 = vsel %vm3717_vm4, %v2665_v20, %v3930_v36  ;;  %v2223_v36 = vshll.u32 %v2203_v35, 16  ;;  %v2234_v13 = vshrl.u32 %v2205_v23, 16  ;;  %v2237_v56 = vshll.u32 %v2205_v23, 16  ;;  %v2215_v16 = vld [vmem:[#allocation2 + $0x64] sm:$0xf] }
  0xd0   : > { %2949 = vmatpush3.bf16.msra.mxu1 %v3292_v31  ;;  %v2670_v18 = vcombine.low %v1128_v10, %v1141_v8  ;;  %v1154_v37 = vsel %vm3717_vm4, %v2666_v3, %v1153_v22  ;;  %v2243_v31 = vshll.u32 %v2206_v28, 16  ;;  %v2212_v22 = vld [vmem:[#allocation2 + $0x50] sm:$0x1]  ;;  %v2295_v54 = vrot.slane %v2293_v1, 5  ;;  %v3305_v28 = vld [vmem:[#allocation6 + $0x228] sm:$0xff]  }
  0xd1   : > { %2950 = vmatprep.subr.bf16.mxu1 %v3294_v60  ;;  %v3970_v5 = vcombine.low %v1154_v37, %v1167_v33  ;;  %v2225_v59 = vrot.slane %v2223_v36, 5  ;;  %v2239_v40 = vrot.slane %v2237_v56, 5  ;;  %v2285_v21 = vshll.u32 %v2212_v22, 16  ;;  %v2217_v10 = vld [vmem:[#allocation2 + $0x70] sm:$0xf] }
  0xd2   : > { %3045 = vmatpush3.bf16.msra.mxu0 %v3293_v38  ;;  %v2236_v38 = vrot.slane %v2234_v13, 4  ;;  %v2245_v58 = vrot.slane %v2243_v31, 5  ;;  %v2282_v9 = vor.u32 %v2281_v42, %v2278_v17  ;;  %v2301_v30 = vrot.slane %v2299_v49, 5  ;;  %v2218_v36 = vld [vmem:[#allocation2 + $0x74] sm:$0x1] }
  0xd3   : > { %3046 = vmatprep.subr.bf16.mxu0 %v3295_v44  ;;  %v2226_v51 = vor.u32 %v2225_v59, %v2222_v14  ;;  %v2287_v29 = vrot.slane %v2285_v21, 5  ;;  %v2304_v3 = vshrl.u32 %v2215_v16, 16  ;;  %v2307_v62 = vshll.u32 %v2215_v16, 16  ;;  %v2210_v14 = vld [vmem:[#allocation2 + $0x44] sm:$0x1] }
  0xd4   : > { %2951 = vmatpush3.bf16.msra.mxu1 %v3294_v60  ;;  %v2240_v55 = vor.u32 %v2239_v40, %v2236_v38  ;;  %v2283_v4 = vrot.slane %v2282_v9, 4  ;;  %v2321_v23 = vshll.u32 %v2217_v10, 16  ;;  %v2313_v22 = vshll.u32 %v2216_v27, 16  ;;  %v3306_v38 = vld [vmem:[#allocation6 + $0x230] sm:$0xff]  }
  0xd5   : > { %3080 = vmatprep.subr.bf16.mxu1 %v3298_v32  ;;  %v2227_v60 = vrot.slane %v2226_v51, 4  ;;  %v2306_v35 = vrot.slane %v2304_v3, 4  ;;  %v2309_v24 = vrot.slane %v2307_v62, 5  ;;  %v2271_v51 = vshll.u32 %v2210_v14, 16  ;;  %v2748_v3 = vld [vmem:[%s4055_s2] ss:$0 sm:$0xff] }
  0xd6   : > { %3047 = vmatpush3.bf16.msra.mxu0 %v3295_v44  ;;  %v2241_v34 = vrot.slane %v2240_v55, 4  ;;  %v2296_v44 = vor.u32 %v2295_v54, %v2292_v2  ;;  %v2288_v20 = vsel %vm3759_vm5, %v2283_v4, %v2287_v29  ;;  %v2323_v13 = vrot.slane %v2321_v23, 5  ;;  %v3307_v55 = vld [vmem:[#allocation6 + $0x238] sm:$0xff]  }
  0xd7   : > { %2953 = vmatmul.mubr.bf16.vlgmr.msra.gmra.mrb[0].mxu1 %v2669_v63  ;;  %3056 = vmatprep.subr.bf16.mxu0 %v3298_v32  ;;  %v2232_v25 = vsel %vm3759_vm5, %v2227_v60, %v2231_v61  ;;  %v2209_v63 = vld [vmem:[#allocation2 + $0x40] sm:$0xf]  ;;  %v2310_v59 = vor.u32 %v2309_v24, %v2306_v35  ;;  %v2327_v61 = vshll.u32 %v2218_v36, 16  ;;  %v2315_v43 = vrot.slane %v2313_v22, 5 }
  0xd8   : > { %3088 = vmatpush3.bf16.msra.mxu1 %v3298_v32  ;;  %2956 = vmatprep.mubr.bf16.mxu1 %v2670_v18  ;;  %v2246_v53 = vsel %vm3759_vm5, %v2241_v34, %v2245_v58  ;;  %v2297_v6 = vrot.slane %v2296_v44, 4  ;;  %v2262_v33 = vshrl.u32 %v2209_v63, 16  ;;  %v2273_v60 = vrot.slane %v2271_v51, 5 }
  0xd9   : > { %3081 = vmatprep.subr.bf16.mxu1 %v3968_v19  ;;  %3049 = vmatmul.mubr.bf16.vlgmr.msra.gmra.mrb[0].mxu0 %v2725_v41  ;;  %v2736_v50 = vcombine.low %v2232_v25, %v2246_v53  ;;  %v2311_v12 = vrot.slane %v2310_v59, 4 }
  0xda   : > { %3057 = vmatpush3.bf16.msra.mxu0 %v3298_v32  ;;  %3052 = vmatprep.mubr.bf16.mxu0 %v2726_v47  ;;  %v2207_v32 = vld [vmem:[#allocation2 + $0x34] sm:$0xf]  ;;  %v2302_v11 = vsel %vm3759_vm5, %v2297_v6, %v2301_v30  ;;  %v2264_v0 = vrot.slane %v2262_v33, 4  ;;  %v2208_v47 = vld [vmem:[#allocation2 + $0x38] sm:$0x1] }
  0xdb   : > { %3058 = vmatprep.subr.bf16.mxu0 %v3968_v19  ;;  %v2738_v8 = vcombine.low %v2288_v20, %v2302_v11  ;;  %v2248_v18 = vshrl.u32 %v2207_v32, 16  ;;  %v2251_v37 = vshll.u32 %v2207_v32, 16  ;;  %v2257_v58 = vshll.u32 %v2208_v47, 16 }
  0xdc   : > { %3089 = vmatpush3.bf16.msra.mxu1 %v3968_v19  ;;  %v2316_v17 = vsel %vm3759_vm5, %v2311_v12, %v2315_v43 }
  0xdd   : > { %3082 = vmatprep.subr.bf16.mxu1 %v3302_v48  ;;  %v2250_v56 = vrot.slane %v2248_v18, 4  ;;  %v2253_v31 = vrot.slane %v2251_v37, 5  ;;  %v2259_v1 = vrot.slane %v2257_v58, 5 }
  0xde   : > { %3059 = vmatpush3.bf16.msra.mxu0 %v3968_v19  ;;  %v2265_v19 = vshll.u32 %v2209_v63, 16 }
  0xdf   : > { %2957 = vmatmul.mubr.bf16.gmra.mrb[4].mxu1 %v3970_v5  ;;  %3060 = vmatprep.subr.bf16.mxu0 %v3302_v48  ;;  %v2318_v5 = vshrl.u32 %v2217_v10, 16  ;;  %v2254_v40 = vor.u32 %v2253_v31, %v2250_v56 }
  0xe0   : > { %3090 = vmatpush3.bf16.msra.mxu1 %v3302_v48  ;;  %3076 = vmatprep.mubr.bf16.mxu1 %v2738_v8  ;;  %v2267_v41 = vrot.slane %v2265_v19, 5 }
  0xe1   : > { %3083 = vmatprep.subr.bf16.mxu1 %v3303_v7  ;;  %3053 = vmatmul.mubr.bf16.gmra.mrb[4].mxu0 %v2727_v26  ;;  %v2320_v57 = vrot.slane %v2318_v5, 4  ;;  %v2255_v52 = vrot.slane %v2254_v40, 4 }
  0xe2   : > { %3061 = vmatpush3.bf16.msra.mxu0 %v3302_v48  ;;  %3072 = vmatprep.mubr.bf16.mxu0 %v2736_v50  ;;  %v2268_v39 = vor.u32 %v2267_v41, %v2264_v0  ;;  %v2329_v48 = vrot.slane %v2327_v61, 5 }
  0xe3   : > { %3062 = vmatprep.subr.bf16.mxu0 %v3303_v7  ;;  %v2324_v46 = vor.u32 %v2323_v13, %v2320_v57  ;;  %v2260_v34 = vsel %vm3759_vm5, %v2255_v52, %v2259_v1 }
  0xe4   : > { %3091 = vmatpush3.bf16.msra.mxu1 %v3303_v7  ;;  %v2269_v49 = vrot.slane %v2268_v39, 4 }
  0xe5   : > { %3084 = vmatprep.subr.bf16.mxu1 %v3304_v15  ;;  %v2325_v21 = vrot.slane %v2324_v46, 4 }
  0xe6   : > { %3063 = vmatpush3.bf16.msra.mxu0 %v3303_v7  ;;  %v2274_v2 = vsel %vm3759_vm5, %v2269_v49, %v2273_v60 }
  0xe7   : > { %3064 = vmatprep.subr.bf16.mxu0 %v3304_v15  ;;  %v2330_v42 = vsel %vm3759_vm5, %v2325_v21, %v2329_v48  ;;  %v2737_v25 = vcombine.low %v2260_v34, %v2274_v2 }
  0xe8   : > { %3092 = vmatpush3.bf16.msra.mxu1 %v3304_v15  ;;  %v2739_v54 = vcombine.low %v2316_v17, %v2330_v42 }
  0xe9   : > { %3085 = vmatprep.subr.bf16.mxu1 %v3305_v28 }
  0xea   : > { %3065 = vmatpush3.bf16.msra.mxu0 %v3304_v15 }
  0xeb   : > { %3066 = vmatprep.subr.bf16.mxu0 %v3305_v28 }
  0xec   : > { %3093 = vmatpush3.bf16.msra.mxu1 %v3305_v28 }
  0xed   : > { %3086 = vmatprep.subr.bf16.mxu1 %v3306_v38 }
  0xee   : > { %3067 = vmatpush3.bf16.msra.mxu0 %v3305_v28 }
  0xef   : > { %3068 = vmatprep.subr.bf16.mxu0 %v3306_v38 }
  0xf0   : > { %3094 = vmatpush3.bf16.msra.mxu1 %v3306_v38 }
  0xf1   : > { %3087 = vmatprep.subr.bf16.mxu1 %v3307_v55 }
  0xf2   : > { %3069 = vmatpush3.bf16.msra.mxu0 %v3306_v38 }
  0xf3   : > { %3070 = vmatprep.subr.bf16.mxu0 %v3307_v55 }
  0xf4   : > { %3095 = vmatpush3.bf16.msra.mxu1 %v3307_v55 }
  0xf6   : > { %3071 = vmatpush3.bf16.msra.mxu0 %v3307_v55 }
  0xf7   : > { %3077 = vmatmul.mubr.bf16.vlgmr.msra.gmra.mrb[8].mxu1 %v2739_v54 }
  0xf9   : > { %3073 = vmatmul.mubr.bf16.vlgmr.msra.gmra.mrb[0].mxu0 %v2737_v25 }
 0x1aa   : > { %v2954_v9 = vpop.f32.mrb[0].mxu1 }
 0x1ab   : > { %v1283_v29 = vpop.f32.mrb[1].mxu1 }
 0x1ac   : > { %v2955_v7 = vpop.f32.mrb[2].mxu1 }
 0x1ad   : > { %v1286_v53 = vpop.f32.mrb[3].mxu1 }
 0x1b2   : > { %v2958_v44 = vpop.f32.mrb[4].mxu1 }
 0x1b3   : > { %v1299_v30 = vpop.f32.mrb[5].mxu1 }
 0x1b4   : > { %v2959_v16 = vpop.f32.mrb[6].mxu1  ;;  %v3054_v26 = vpop.f32.mrb[4].mxu0 }
 0x1b5   : > { %v1302_v4 = vpop.f32.mrb[7].mxu1  ;;  %v3100_v50 = vadd.f32 %v3054_v26, %v2958_v44  ;;  %v2180_v45 = vpop.f32.mrb[5].mxu0 }
 0x1b6   : > { %v3102_v6 = vadd.f32 %v2180_v45, %v1299_v30  ;;  %v3055_v32 = vpop.f32.mrb[6].mxu0 }
 0x1b7   : > { %v3104_v20 = vadd.f32 %v3055_v32, %v2959_v16  ;;  %v2183_v63 = vpop.f32.mrb[7].mxu0 }
 0x1b8   : > { %v3106_v10 = vadd.f32 %v2183_v63, %v1302_v4 }
 0x1ca   : > { %v3078_v15 = vpop.f32.mrb[8].mxu1 }
 0x1cb   : > { %v3101_v11 = vadd.f32 %v3100_v50, %v3078_v15  ;;  %v2462_v62 = vpop.f32.mrb[9].mxu1 }
 0x1cc   : > { %v3103_v8 = vadd.f32 %v3102_v6, %v2462_v62  ;;  %v3079_v18 = vpop.f32.mrb[10].mxu1  ;;  %v3074_v37 = vpop.f32.mrb[0].mxu0 }
 0x1cd   : > { %v2498_v33 = vadd.f32 %v3101_v11, %v2748_v3  ;;  %v3105_v19 = vadd.f32 %v3104_v20, %v3079_v18  ;;  %v2465_v5 = vpop.f32.mrb[11].mxu1  ;;  %v3096_v35 = vadd.f32 %v3074_v37, %v2954_v9  ;;  %v2446_v24 = vpop.f32.mrb[1].mxu0 }
 0x1ce   : > { %v2496_v23 = vadd.f32 %v3103_v8, %v2748_v3  ;;  %v3107_v28 = vadd.f32 %v3106_v10, %v2465_v5  ;;  %v3097_v27 = vadd.f32 %v2446_v24, %v1283_v29  ;;  %v3075_v36 = vpop.f32.mrb[2].mxu0 }
 0x1cf   : > { %2506 = vst [vmem:[%s203_s25 + $0x30] sm:$0xff] %v2498_v33  ;;  %v2499_v57 = vadd.f32 %v3105_v19, %v2748_v3  ;;  %v2494_v13 = vadd.f32 %v3096_v35, %v2748_v3  ;;  %v3098_v56 = vadd.f32 %v3075_v36, %v2955_v7  ;;  %v2449_v31 = vpop.f32.mrb[3].mxu0 }
 0x1d0   : > { %2504 = vst [vmem:[%s203_s25 + $0x20] sm:$0xff] %v2496_v23  ;;  %v2497_v0 = vadd.f32 %v3107_v28, %v2748_v3  ;;  %v2492_v41 = vadd.f32 %v3097_v27, %v2748_v3  ;;  %v3099_v47 = vadd.f32 %v2449_v31, %v1286_v53 }
 0x1d1   : > { %2507 = vst [vmem:[%s203_s25 + $0x38] sm:$0xff] %v2499_v57  ;;  %2502 = vst [vmem:[%s203_s25 + $0x10] sm:$0xff] %v2494_v13  ;;  %v2495_v14 = vadd.f32 %v3098_v56, %v2748_v3 }
 0x1d2   : > { %2505 = vst [vmem:[%s203_s25 + $0x28] sm:$0xff] %v2497_v0  ;;  %2500 = vst [vmem:[%s203_s25] sm:$0xff] %v2492_v41  ;;  %v2493_v59 = vadd.f32 %v3099_v47, %v2748_v3 }
 0x1d3   : > { %2503 = vst [vmem:[%s203_s25 + $0x18] sm:$0xff] %v2495_v14 }
 0x1d4   : > { %2501 = vst [vmem:[%s203_s25 + $0x8] sm:$0xff] %v2493_v59 }
 0x1d5   : > { %3379 = shalt.err (!%p3376_p7)
}
 0x1d6   : > { %s3380_s22 = scalar_lea.hbm %s4009_s11, 1024  ;;  %s3384_s9 = scalar_lea.hbm %s4056_s3, 2048 }
 0x1d7   : > { %p3381_p9 = scmp.ne.s32.totalorder %s4009_s11, %s3380_s22  ;;  %p3385_p5 = scmp.lt.u32.totalorder %s4009_s11, %s4056_s3 }
 0x1d8   : > { %p3386_p11 = scmp.lt.u32.totalorder %s3384_s9, %s3380_s22  ;;  %p3388_p4 = scmp.lt.u32.totalorder %s3380_s22, %s4009_s11 }
 0x1d9   : > { %p3382_p2 = pnand %p3381_p9, %p3559_p12 }
 0x1da   : > { %p3387_p1 = por %p3386_p11, %p3385_p5 }
 0x1db   : > { %p3383_p0 = pneg %p3382_p2 }
 0x1dc   : > { %p3389_p6 = por %p3388_p4, %p3387_p1 }
 0x1de   : > { %p3390_p8 = pnand %p3389_p6, %p3383_p0 }
 0x1e0   : > { %3393 = shalt.err (!%p3390_p8)
}
 0x1e1   : > { %s3446_s4 = smov 128   ;;  %s3447_s25 = smov 8  }
 0x1e2   : > { %3166 = dma.vmem_to_hbm [thread:$0]  (%p3559_p12), %s4004_s26, 1024, %s4009_s11, %s2509_s27, %s3446_s4, %s3446_s4, %s3447_s25  }
 0x1e3 PF: > { %s2537_s5 = sand.u32 1, %s3424_s12   ;;  %p4076_p10 = scmp.ne.s32.totalorder %s4061_s19, 0 }
 0x1e4   : > { %p4077_p13 = scmp.ge.s32.totalorder %s3436_s15, 2  ;;  %s2538_s10 = scalar_lea.sflag [#allocation5], %s2537_s5 }
 0x1e6   : > { %p3177_p3 = pnand %p4077_p13, %p4076_p10 }
 0x1e8   : > { %3419 = dma.done.wait (!%p3177_p3), %s2538_s10, 1024  }
 0x1e9   : > { %3421 = vsyncadd (!%p3177_p3), %s2538_s10, 4294966272  ;;  %p17_p7 = scmp.ge.s32.totalorder %s3524_s24, 4   ;;  %s4078_s12 = smov %s3428_s13 }
 0x1ea   : > { %s4079_s13 = smov %s3432_s14  ;;  %s4080_s14 = smov %s3555_s17 }
 0x1eb   : > { %s4081_s15 = smov %s3524_s24  ;;  %19 = sbr.rel (!%p17_p7) target bundleno = 6 (0x6), region = 92 }
 0x1f2   :  { %2543 = vsyncpa [#allocation4], 1 }
 0x1f3   :  { %2545 = vsyncpa [#allocation4 + $0x1], 1 }
 0x1f4   :  { %2546 = vsyncpa [#allocation7], 1 }
 0x1f5   :  { %2547 = vsyncpa [#allocation5], 1 }
 0x1f6   :  { %2549 = vsyncpa [#allocation5 + $0x1], 1 }

</bundles_post_ra>
